<compile_context>
chip_gen: v7x
topology: tpu7x:2x2x1
jax: 0.10.0
libtpu: 0.0.40
codegen_flags: <defaults>
</compile_context>

<pallas_src>
import jax
import jax.numpy as jnp
import numpy as np
from jax.experimental import pallas as pl
from jax.experimental.pallas import tpu as pltpu

# Keep the XLA reference and in-kernel f32 dots in full precision so the 1e-5
# comparison below is meaningful on all TPU generations.
jax.config.update("jax_default_matmul_precision", "highest")


def bahdanau_kernel(q_ref, k_ref, wa_ref, ua_ref, bsum_ref, va_ref,
                    ctx_ref, w_ref):
    # q_ref   : (TB, H)     batch tile of queries (feature-last, lane-dense)
    # k_ref   : (TB, S, H)  batch tile of keys
    # wa_ref  : (H, H)      Wa^T, pre-transposed, grid-constant
    # ua_ref  : (H, H)      Ua^T, pre-transposed, grid-constant
    # bsum_ref: (1, H)      wa_b + ua_b folded into one S-invariant add
    # va_ref  : (1, H)      Va weight row (Va bias dropped: softmax shift-invariant)
    # ctx_ref : (TB, H)     context output (dense store)
    # w_ref   : (TB, S)     attention-weights output (dense store)
    TB, S, H = k_ref.shape

    q = q_ref[...]                         # (TB, H)
    k = k_ref[...]                         # (TB, S, H)

    # Wa(query): one (TB, H) @ (H, H) MXU matmul; both Linear biases folded here
    # (saves a (TB*S, H) VPU add per step on the keys path).
    qw = (jnp.dot(q, wa_ref[...], preferred_element_type=jnp.float32)
          + bsum_ref[...])

    # Ua(keys): one (TB*S, H) @ (H, H) MXU matmul for the whole batch tile.
    ku = jnp.dot(k.reshape(TB * S, H), ua_ref[...],
                 preferred_element_type=jnp.float32)

    # tanh(Wa(q) + Ua(k)) with broadcast over S: (TB, S, H)
    t = jnp.tanh(ku.reshape(TB, S, H) + qw[:, None, :])

    # Va projection -> lane-major scores (TB, S): contract H (the lane axis).
    s = jnp.sum(t * va_ref[...], axis=-1)

    # Numerically stable softmax over S, all along the lane axis.
    m = jnp.max(s, axis=-1, keepdims=True)
    e = jnp.exp(s - m)
    w = e * pl.reciprocal(jnp.sum(e, axis=-1, keepdims=True), approx=False)

    # context = weights @ keys.
    if S >= 128:
        # Enough contraction rows to feed the MXU: batched (1,S)@(S,H) einsum.
        ctx = jnp.einsum("bqs,bsh->bqh", w[:, None, :].astype(k.dtype), k,
                         preferred_element_type=jnp.float32)[:, 0, :]
    else:
        # Small S: VPU multiply + sublane reduce beats TB tiny M=1 matmuls that
        # would each use <1/16 of the MXU rows and pop the result FIFO.
        ctx = jnp.sum(w[:, :, None] * k, axis=1)      # (TB, H), f32

    ctx_ref[...] = ctx.astype(ctx_ref.dtype)           # (TB, H) dense store
    w_ref[...] = w.astype(w_ref.dtype)                 # (TB, S) dense store

    # TODO(synk): optional `mask` argument (masked_fill with -inf before the max
    # subtraction, plus an all-masked-row guard) not implemented; the module's
    # default path uses mask=None.


def _vmem_capacity_bytes():
    """Per-core VMEM capacity (128 MiB v5e/v6e, 64 MiB v7x), with a safe fallback."""
    try:
        return int(pltpu.get_tpu_info().vmem_capacity_bytes)
    except Exception:
        return 64 * 1024 * 1024   # conservative: v7x per-TensorCore VMEM


def _choose_batch_tile(B, tb_vmem, min_grid_steps):
    """Largest VMEM-feasible sublane-aligned tile, preferring an even number of
    grid steps (>= min_grid_steps at large B => >= 2 steps per v7x TensorCore)."""
    if B <= 8:
        return B, 1                                   # tiny batch: one full-array step
    tb_cap = max(8, (min(tb_vmem, B) // 8) * 8)        # VMEM cap, multiple of 8
    nb = max(-(-B // tb_cap), min_grid_steps)
    if nb > 1 and nb % 2:
        nb += 1
    tb = min(tb_cap, max(8, ((-(-B // nb) + 7) // 8) * 8))
    nb = -(-B // tb)
    if nb > 1 and nb % 2:
        nb += 1                                        # even step count for 2 TCs
    return tb, nb


def bahdanau_attention(query, keys, params, *, use_bf16_mxu=False,
                       min_grid_steps=4):
    """query: (B, 1, H), keys: (B, S, H) -> (context (B,1,H), weights (B,1,S))."""
    B, _, H = query.shape
    S = keys.shape[1]

    wa_w, wa_b, ua_w, ua_b, va_w, va_b = params
    del va_b   # softmax shift-invariance: the Va bias affects neither output

    # bf16 operands feed the v6e/v7x MXU natively and halve keys HBM/DMA bytes;
    # accumulation stays f32.  Default f32 keeps 1e-5 parity with the reference.
    in_dtype = jnp.bfloat16 if use_bf16_mxu else jnp.float32
    isz = 2 if use_bf16_mxu else 4

    wa_t = wa_w.T.astype(in_dtype)                        # (H, H) pre-transposed
    ua_t = ua_w.T.astype(in_dtype)                        # (H, H)
    b_sum = (wa_b + ua_b).reshape(1, H).astype(jnp.float32)
    va_row = va_w.reshape(1, H).astype(jnp.float32)

    q2 = query.reshape(B, H).astype(in_dtype)             # lane-dense 2-D query
    k3 = keys.astype(in_dtype)

    # ---- per-generation VMEM budget and batch-tile auto-sizing ----
    vmem_cap = _vmem_capacity_bytes()
    budget = max(32 << 20, min(int(0.85 * vmem_cap), vmem_cap - (4 << 20)))
    headroom = 2 << 20

    weight_bytes = 2 * H * H * isz + 2 * H * 4             # Wa^T, Ua^T, b_sum, Va
    io_row = 2 * ((H + S * H) * isz + (H + S) * 4)          # double-buffered in/out per row
    interm_row = (2 * S * H + 2 * H + 4 * S) * 4            # f32 temporaries per row

    # Budget weights as double-buffered (fallback case); Buffered(1) only helps.
    tb_vmem = max(1, (budget - 2 * weight_bytes - headroom) // (io_row + interm_row))
    TB, nb = _choose_batch_tile(B, tb_vmem, min_grid_steps)
    B_pad = nb * TB

    if B_pad != B:
        q2 = jnp.pad(q2, ((0, B_pad - B), (0, 0)))
        k3 = jnp.pad(k3, ((0, B_pad - B), (0, 0), (0, 0)))

    block_bytes = TB * ((H + S * H) * isz + (H + S) * 4)
    vmem_limit = int(np.clip(2 * block_bytes + 2 * weight_bytes
                             + TB * interm_row + headroom,
                             16 << 20, budget))

    out_shape = (jax.ShapeDtypeStruct((B_pad, H), jnp.float32),
                 jax.ShapeDtypeStruct((B_pad, S), jnp.float32))

    def call(single_buffer_weights):
        if single_buffer_weights:
            # Grid-constant operands: single VMEM buffer (they are never re-fetched).
            const_spec = lambda shape: pl.BlockSpec(
                shape, lambda b: (0,) * len(shape), pipeline_mode=pl.Buffered(1))
        else:
            const_spec = lambda shape: pl.BlockSpec(
                shape, lambda b: (0,) * len(shape))

        grid_spec = pltpu.PrefetchScalarGridSpec(
            num_scalar_prefetch=0,
            grid=(nb,),
            in_specs=[
                pl.BlockSpec((TB, H), lambda b: (b, 0)),        # query tile
                pl.BlockSpec((TB, S, H), lambda b: (b, 0, 0)),  # keys tile
                const_spec((H, H)),                             # Wa^T (constant)
                const_spec((H, H)),                             # Ua^T (constant)
                const_spec((1, H)),                             # folded bias
                const_spec((1, H)),                             # Va row
            ],
            out_specs=[
                pl.BlockSpec((TB, H), lambda b: (b, 0)),        # context (dense)
                pl.BlockSpec((TB, S), lambda b: (b, 0)),        # weights (dense)
            ],
        )
        return pl.pallas_call(
            bahdanau_kernel,
            out_shape=out_shape,
            grid_spec=grid_spec,
            compiler_params=pltpu.CompilerParams(
                dimension_semantics=("parallel",),
                vmem_limit_bytes=vmem_limit,
            ),
        )(q2, k3, wa_t, ua_t, b_sum, va_row)

    try:
        context2, weights2 = call(single_buffer_weights=True)
    except Exception:
        # Runtime without BlockSpec.pipeline_mode support on TPU: identical
        # math, weights simply stay double-buffered.
        context2, weights2 = call(single_buffer_weights=False)

    context = context2[:B].reshape(B, 1, H)
    weights = weights2[:B].reshape(B, 1, S)
    return context, weights


def init_params(key, hidden_size):
    """Deterministic init mimicking nn.Linear (uniform +-1/sqrt(fan_in))."""
    ks = jax.random.split(key, 6)
    bound = 1.0 / np.sqrt(hidden_size)
    wa_w = jax.random.uniform(ks[0], (hidden_size, hidden_size), jnp.float32, -bound, bound)
    wa_b = jax.random.uniform(ks[1], (hidden_size,), jnp.float32, -bound, bound)
    ua_w = jax.random.uniform(ks[2], (hidden_size, hidden_size), jnp.float32, -bound, bound)
    ua_b = jax.random.uniform(ks[3], (hidden_size,), jnp.float32, -bound, bound)
    va_w = jax.random.uniform(ks[4], (1, hidden_size), jnp.float32, -bound, bound)
    va_b = jax.random.uniform(ks[5], (1,), jnp.float32, -bound, bound)
    return wa_w, wa_b, ua_w, ua_b, va_w, va_b


def reference(query, keys, params):
    wa_w, wa_b, ua_w, ua_b, va_w, va_b = params
    qw = query @ wa_w.T + wa_b                       # (B, 1, H)
    ku = keys @ ua_w.T + ua_b                        # (B, S, H)
    s = jnp.tanh(qw + ku) @ va_w.T + va_b            # (B, S, 1)
    s = jnp.transpose(s, (0, 2, 1))                  # (B, 1, S)
    w = jax.nn.softmax(s, axis=-1)
    ctx = jnp.einsum("bqs,bsh->bqh", w, keys)
    return ctx, w


if __name__ == "__main__":
    # (B, S, H): batch-tiled case, a padded (non-multiple) case, and a tiny batch.
    configs = [(16, 8, 32), (10, 8, 32), (2, 8, 32)]
    key = jax.random.PRNGKey(0)
    for (B, S, H) in configs:
        key, kq, kk, kp = jax.random.split(key, 4)
        query = jax.random.normal(kq, (B, 1, H), jnp.float32)
        keys = jax.random.normal(kk, (B, S, H), jnp.float32)
        params = init_params(kp, H)

        ctx, w = bahdanau_attention(query, keys, params)
        jax.block_until_ready((ctx, w))

        ctx_ref, w_ref = reference(query, keys, params)
        np.testing.assert_allclose(np.asarray(ctx), np.asarray(ctx_ref),
                                   atol=1e-5, rtol=1e-5)
        np.testing.assert_allclose(np.asarray(w), np.asarray(w_ref),
                                   atol=1e-5, rtol=1e-5)

    # Opt-in bf16 MXU/DMA fast path (v6e/v7x throughput, v5e bandwidth) —
    # looser tolerance by construction (f32 accumulation, bf16 operands).
    B, S, H = 8, 8, 32
    key, kq, kk, kp = jax.random.split(key, 4)
    query = jax.random.normal(kq, (B, 1, H), jnp.float32)
    keys = jax.random.normal(kk, (B, S, H), jnp.float32)
    params = init_params(kp, H)
    ctx, w = bahdanau_attention(query, keys, params, use_bf16_mxu=True)
    jax.block_until_ready((ctx, w))
    ctx_ref, w_ref = reference(query, keys, params)
    np.testing.assert_allclose(np.asarray(ctx), np.asarray(ctx_ref),
                               atol=5e-2, rtol=5e-2)
    np.testing.assert_allclose(np.asarray(w), np.asarray(w_ref),
                               atol=5e-2, rtol=5e-2)

    print("KERNEL_OK")
</pallas_src>

<mosaic_0001>
module attributes {stable_mosaic.version = 11 : i64} {
  func.func @bahdanau_kernel(%arg0: i32, %arg1: memref<8x32xf32, #tpu.memory_space<vmem>>, %arg2: memref<8x8x32xf32, #tpu.memory_space<vmem>>, %arg3: memref<32x32xf32, #tpu.memory_space<vmem>>, %arg4: memref<32x32xf32, #tpu.memory_space<vmem>>, %arg5: memref<1x32xf32, #tpu.memory_space<vmem>>, %arg6: memref<1x32xf32, #tpu.memory_space<vmem>>, %arg7: memref<8x32xf32, #tpu.memory_space<vmem>>, %arg8: memref<8x8xf32, #tpu.memory_space<vmem>>) attributes {dimension_semantics = [#tpu.dimension_semantics<parallel>], iteration_bounds = array<i64: 2>, scalar_prefetch = 0 : i64, scratch_operands = 0 : i64, tpu.core_type = #tpu.core_type<tc>, window_params = [{transform_indices = @transform_0, window_bounds = array<i64: 8, 32>}, {transform_indices = @transform_1, window_bounds = array<i64: 8, 8, 32>}, {pipeline_mode = #tpu.pipeline_mode<synchronous>, transform_indices = @transform_2, window_bounds = array<i64: 32, 32>}, {pipeline_mode = #tpu.pipeline_mode<synchronous>, transform_indices = @transform_3, window_bounds = array<i64: 32, 32>}, {pipeline_mode = #tpu.pipeline_mode<synchronous>, transform_indices = @transform_4, window_bounds = array<i64: 1, 32>}, {pipeline_mode = #tpu.pipeline_mode<synchronous>, transform_indices = @transform_5, window_bounds = array<i64: 1, 32>}, {transform_indices = @transform_6, window_bounds = array<i64: 8, 32>}, {transform_indices = @transform_7, window_bounds = array<i64: 8, 8>}]} {
    %c0 = arith.constant 0 : index
    %c0_0 = arith.constant 0 : index
    %0 = vector.load %arg1[%c0, %c0_0] : memref<8x32xf32, #tpu.memory_space<vmem>>, vector<8x32xf32>
    %c0_1 = arith.constant 0 : index
    %c0_2 = arith.constant 0 : index
    %c0_3 = arith.constant 0 : index
    %1 = vector.load %arg2[%c0_1, %c0_2, %c0_3] : memref<8x8x32xf32, #tpu.memory_space<vmem>>, vector<8x8x32xf32>
    %c0_4 = arith.constant 0 : index
    %c0_5 = arith.constant 0 : index
    %2 = vector.load %arg3[%c0_4, %c0_5] : memref<32x32xf32, #tpu.memory_space<vmem>>, vector<32x32xf32>
    %cst = arith.constant dense<0.000000e+00> : vector<8x32xf32>
    %3 = tpu.matmul %0, %2, %cst {dimension_numbers = #tpu.dot_dimension_numbers<[1], [0], [0], [1], [0, 0, 1, 1], [], []>, precision = #tpu.contract_precision<fp32>} : vector<8x32xf32>, vector<32x32xf32>, vector<8x32xf32> -> vector<8x32xf32>
    %c0_6 = arith.constant 0 : index
    %c0_7 = arith.constant 0 : index
    %4 = vector.load %arg5[%c0_6, %c0_7] : memref<1x32xf32, #tpu.memory_space<vmem>>, vector<1x32xf32>
    %5 = vector.broadcast %4 : vector<1x32xf32> to vector<8x32xf32>
    %6 = arith.addf %3, %5 : vector<8x32xf32>
    %7 = vector.shape_cast %1 : vector<8x8x32xf32> to vector<64x32xf32>
    %c0_8 = arith.constant 0 : index
    %c0_9 = arith.constant 0 : index
    %8 = vector.load %arg4[%c0_8, %c0_9] : memref<32x32xf32, #tpu.memory_space<vmem>>, vector<32x32xf32>
    %cst_10 = arith.constant dense<0.000000e+00> : vector<64x32xf32>
    %9 = tpu.matmul %7, %8, %cst_10 {dimension_numbers = #tpu.dot_dimension_numbers<[1], [0], [0], [1], [0, 0, 1, 1], [], []>, precision = #tpu.contract_precision<fp32>} : vector<64x32xf32>, vector<32x32xf32>, vector<64x32xf32> -> vector<64x32xf32>
    %10 = vector.shape_cast %9 : vector<64x32xf32> to vector<8x8x32xf32>
    %11 = vector.shape_cast %6 : vector<8x32xf32> to vector<8x1x32xf32>
    %12 = vector.broadcast %11 : vector<8x1x32xf32> to vector<8x8x32xf32>
    %13 = arith.addf %10, %12 : vector<8x8x32xf32>
    %14 = math.tanh %13 : vector<8x8x32xf32>
    %c0_11 = arith.constant 0 : index
    %c0_12 = arith.constant 0 : index
    %15 = vector.load %arg6[%c0_11, %c0_12] : memref<1x32xf32, #tpu.memory_space<vmem>>, vector<1x32xf32>
    %16 = vector.shape_cast %15 : vector<1x32xf32> to vector<1x1x32xf32>
    %17 = vector.broadcast %16 : vector<1x1x32xf32> to vector<8x8x32xf32>
    %18 = arith.mulf %14, %17 : vector<8x8x32xf32>
    %cst_13 = arith.constant dense<0.000000e+00> : vector<8x8xf32>
    %19 = vector.multi_reduction <add>, %18, %cst_13 [2] : vector<8x8x32xf32> to vector<8x8xf32>
    %cst_14 = arith.constant dense<0xFF800000> : vector<8xf32>
    %20 = vector.multi_reduction <maximumf>, %19, %cst_14 [1] : vector<8x8xf32> to vector<8xf32>
    %21 = vector.shape_cast %20 : vector<8xf32> to vector<8x1xf32>
    %22 = vector.broadcast %21 : vector<8x1xf32> to vector<8x8xf32>
    %23 = arith.subf %19, %22 : vector<8x8xf32>
    %24 = math.exp %23 : vector<8x8xf32>
    %cst_15 = arith.constant dense<0.000000e+00> : vector<8xf32>
    %25 = vector.multi_reduction <add>, %24, %cst_15 [1] : vector<8x8xf32> to vector<8xf32>
    %26 = vector.shape_cast %25 : vector<8xf32> to vector<8x1xf32>
    %27 = tpu.reciprocal %26 : vector<8x1xf32> -> vector<8x1xf32>
    %28 = vector.broadcast %27 : vector<8x1xf32> to vector<8x8xf32>
    %29 = arith.mulf %24, %28 : vector<8x8xf32>
    %30 = vector.shape_cast %29 : vector<8x8xf32> to vector<8x8x1xf32>
    %31 = vector.broadcast %30 : vector<8x8x1xf32> to vector<8x8x32xf32>
    %32 = arith.mulf %31, %1 : vector<8x8x32xf32>
    %cst_16 = arith.constant dense<0.000000e+00> : vector<8x32xf32>
    %33 = vector.multi_reduction <add>, %32, %cst_16 [1] : vector<8x8x32xf32> to vector<8x32xf32>
    %c0_17 = arith.constant 0 : index
    %c0_18 = arith.constant 0 : index
    %34 = vector.load %arg7[%c0_17, %c0_18] : memref<8x32xf32, #tpu.memory_space<vmem>>, vector<8x32xf32>
    tpu.vector_store %arg7[%c0_17, %c0_18], %33 {strides = array<i32>} : memref<8x32xf32, #tpu.memory_space<vmem>>, vector<8x32xf32>,
    %c0_19 = arith.constant 0 : index
    %c0_20 = arith.constant 0 : index
    %35 = vector.load %arg8[%c0_19, %c0_20] : memref<8x8xf32, #tpu.memory_space<vmem>>, vector<8x8xf32>
    tpu.vector_store %arg8[%c0_19, %c0_20], %29 {strides = array<i32>} : memref<8x8xf32, #tpu.memory_space<vmem>>, vector<8x8xf32>,
    return
  }
  func.func @transform_0(%arg0: i32) -> (i32, i32) {
    %c0_i32 = arith.constant 0 : i32
    %c0_i32_0 = arith.constant 0 : i32
    return %arg0, %c0_i32 : i32, i32
  }
  func.func @transform_1(%arg0: i32) -> (i32, i32, i32) {
    %c0_i32 = arith.constant 0 : i32
    %c0_i32_0 = arith.constant 0 : i32
    %c0_i32_1 = arith.constant 0 : i32
    return %arg0, %c0_i32, %c0_i32_0 : i32, i32, i32
  }
  func.func @transform_2(%arg0: i32) -> (i32, i32) {
    %c0_i32 = arith.constant 0 : i32
    %c0_i32_0 = arith.constant 0 : i32
    %c0_i32_1 = arith.constant 0 : i32
    return %c0_i32, %c0_i32_0 : i32, i32
  }
  func.func @transform_3(%arg0: i32) -> (i32, i32) {
    %c0_i32 = arith.constant 0 : i32
    %c0_i32_0 = arith.constant 0 : i32
    %c0_i32_1 = arith.constant 0 : i32
    return %c0_i32, %c0_i32_0 : i32, i32
  }
  func.func @transform_4(%arg0: i32) -> (i32, i32) {
    %c0_i32 = arith.constant 0 : i32
    %c0_i32_0 = arith.constant 0 : i32
    %c0_i32_1 = arith.constant 0 : i32
    return %c0_i32, %c0_i32_0 : i32, i32
  }
  func.func @transform_5(%arg0: i32) -> (i32, i32) {
    %c0_i32 = arith.constant 0 : i32
    %c0_i32_0 = arith.constant 0 : i32
    %c0_i32_1 = arith.constant 0 : i32
    return %c0_i32, %c0_i32_0 : i32, i32
  }
  func.func @transform_6(%arg0: i32) -> (i32, i32) {
    %c0_i32 = arith.constant 0 : i32
    %c0_i32_0 = arith.constant 0 : i32
    return %arg0, %c0_i32 : i32, i32
  }
  func.func @transform_7(%arg0: i32) -> (i32, i32) {
    %c0_i32 = arith.constant 0 : i32
    %c0_i32_0 = arith.constant 0 : i32
    return %arg0, %c0_i32 : i32, i32
  }
}

module attributes {stable_mosaic.version = 11 : i64} {
  func.func @bahdanau_kernel(%arg0: i32, %arg1: memref<8x32xf32, #tpu.memory_space<vmem>>, %arg2: memref<8x8x32xf32, #tpu.memory_space<vmem>>, %arg3: memref<32x32xf32, #tpu.memory_space<vmem>>, %arg4: memref<32x32xf32, #tpu.memory_space<vmem>>, %arg5: memref<1x32xf32, #tpu.memory_space<vmem>>, %arg6: memref<1x32xf32, #tpu.memory_space<vmem>>, %arg7: memref<8x32xf32, #tpu.memory_space<vmem>>, %arg8: memref<8x8xf32, #tpu.memory_space<vmem>>) attributes {dimension_semantics = [#tpu.dimension_semantics<parallel>], iteration_bounds = array<i64: 2>, scalar_prefetch = 0 : i64, scratch_operands = 0 : i64, tpu.core_type = #tpu.core_type<tc>, window_params = [{transform_indices = @transform_0, window_bounds = array<i64: 8, 32>}, {transform_indices = @transform_1, window_bounds = array<i64: 8, 8, 32>}, {pipeline_mode = #tpu.pipeline_mode<synchronous>, transform_indices = @transform_2, window_bounds = array<i64: 32, 32>}, {pipeline_mode = #tpu.pipeline_mode<synchronous>, transform_indices = @transform_3, window_bounds = array<i64: 32, 32>}, {pipeline_mode = #tpu.pipeline_mode<synchronous>, transform_indices = @transform_4, window_bounds = array<i64: 1, 32>}, {pipeline_mode = #tpu.pipeline_mode<synchronous>, transform_indices = @transform_5, window_bounds = array<i64: 1, 32>}, {transform_indices = @transform_6, window_bounds = array<i64: 8, 32>}, {transform_indices = @transform_7, window_bounds = array<i64: 8, 8>}]} {
    %c0 = arith.constant 0 : index
    %c0_0 = arith.constant 0 : index
    %0 = vector.load %arg1[%c0, %c0_0] : memref<8x32xf32, #tpu.memory_space<vmem>>, vector<8x32xf32>
    %c0_1 = arith.constant 0 : index
    %c0_2 = arith.constant 0 : index
    %c0_3 = arith.constant 0 : index
    %1 = vector.load %arg2[%c0_1, %c0_2, %c0_3] : memref<8x8x32xf32, #tpu.memory_space<vmem>>, vector<8x8x32xf32>
    %c0_4 = arith.constant 0 : index
    %c0_5 = arith.constant 0 : index
    %2 = vector.load %arg3[%c0_4, %c0_5] : memref<32x32xf32, #tpu.memory_space<vmem>>, vector<32x32xf32>
    %cst = arith.constant dense<0.000000e+00> : vector<8x32xf32>
    %3 = tpu.matmul %0, %2, %cst {dimension_numbers = #tpu.dot_dimension_numbers<[1], [0], [0], [1], [0, 0, 1, 1], [], []>, precision = #tpu.contract_precision<fp32>} : vector<8x32xf32>, vector<32x32xf32>, vector<8x32xf32> -> vector<8x32xf32>
    %c0_6 = arith.constant 0 : index
    %c0_7 = arith.constant 0 : index
    %4 = vector.load %arg5[%c0_6, %c0_7] : memref<1x32xf32, #tpu.memory_space<vmem>>, vector<1x32xf32>
    %5 = vector.broadcast %4 : vector<1x32xf32> to vector<8x32xf32>
    %6 = arith.addf %3, %5 : vector<8x32xf32>
    %7 = vector.shape_cast %1 : vector<8x8x32xf32> to vector<64x32xf32>
    %c0_8 = arith.constant 0 : index
    %c0_9 = arith.constant 0 : index
    %8 = vector.load %arg4[%c0_8, %c0_9] : memref<32x32xf32, #tpu.memory_space<vmem>>, vector<32x32xf32>
    %cst_10 = arith.constant dense<0.000000e+00> : vector<64x32xf32>
    %9 = tpu.matmul %7, %8, %cst_10 {dimension_numbers = #tpu.dot_dimension_numbers<[1], [0], [0], [1], [0, 0, 1, 1], [], []>, precision = #tpu.contract_precision<fp32>} : vector<64x32xf32>, vector<32x32xf32>, vector<64x32xf32> -> vector<64x32xf32>
    %10 = vector.shape_cast %9 : vector<64x32xf32> to vector<8x8x32xf32>
    %11 = vector.shape_cast %6 : vector<8x32xf32> to vector<8x1x32xf32>
    %12 = vector.broadcast %11 : vector<8x1x32xf32> to vector<8x8x32xf32>
    %13 = arith.addf %10, %12 : vector<8x8x32xf32>
    %14 = math.tanh %13 : vector<8x8x32xf32>
    %c0_11 = arith.constant 0 : index
    %c0_12 = arith.constant 0 : index
    %15 = vector.load %arg6[%c0_11, %c0_12] : memref<1x32xf32, #tpu.memory_space<vmem>>, vector<1x32xf32>
    %16 = vector.shape_cast %15 : vector<1x32xf32> to vector<1x1x32xf32>
    %17 = vector.broadcast %16 : vector<1x1x32xf32> to vector<8x8x32xf32>
    %18 = arith.mulf %14, %17 : vector<8x8x32xf32>
    %cst_13 = arith.constant dense<0.000000e+00> : vector<8x8xf32>
    %19 = vector.multi_reduction <add>, %18, %cst_13 [2] : vector<8x8x32xf32> to vector<8x8xf32>
    %cst_14 = arith.constant dense<0xFF800000> : vector<8xf32>
    %20 = vector.multi_reduction <maximumf>, %19, %cst_14 [1] : vector<8x8xf32> to vector<8xf32>
    %21 = vector.shape_cast %20 : vector<8xf32> to vector<8x1xf32>
    %22 = vector.broadcast %21 : vector<8x1xf32> to vector<8x8xf32>
    %23 = arith.subf %19, %22 : vector<8x8xf32>
    %24 = math.exp %23 : vector<8x8xf32>
    %cst_15 = arith.constant dense<0.000000e+00> : vector<8xf32>
    %25 = vector.multi_reduction <add>, %24, %cst_15 [1] : vector<8x8xf32> to vector<8xf32>
    %26 = vector.shape_cast %25 : vector<8xf32> to vector<8x1xf32>
    %27 = tpu.reciprocal %26 : vector<8x1xf32> -> vector<8x1xf32>
    %28 = vector.broadcast %27 : vector<8x1xf32> to vector<8x8xf32>
    %29 = arith.mulf %24, %28 : vector<8x8xf32>
    %30 = vector.shape_cast %29 : vector<8x8xf32> to vector<8x8x1xf32>
    %31 = vector.broadcast %30 : vector<8x8x1xf32> to vector<8x8x32xf32>
    %32 = arith.mulf %31, %1 : vector<8x8x32xf32>
    %cst_16 = arith.constant dense<0.000000e+00> : vector<8x32xf32>
    %33 = vector.multi_reduction <add>, %32, %cst_16 [1] : vector<8x8x32xf32> to vector<8x32xf32>
    %c0_17 = arith.constant 0 : index
    %c0_18 = arith.constant 0 : index
    %34 = vector.load %arg7[%c0_17, %c0_18] : memref<8x32xf32, #tpu.memory_space<vmem>>, vector<8x32xf32>
    tpu.vector_store %arg7[%c0_17, %c0_18], %33 {strides = array<i32>} : memref<8x32xf32, #tpu.memory_space<vmem>>, vector<8x32xf32>,
    %c0_19 = arith.constant 0 : index
    %c0_20 = arith.constant 0 : index
    %35 = vector.load %arg8[%c0_19, %c0_20] : memref<8x8xf32, #tpu.memory_space<vmem>>, vector<8x8xf32>
    tpu.vector_store %arg8[%c0_19, %c0_20], %29 {strides = array<i32>} : memref<8x8xf32, #tpu.memory_space<vmem>>, vector<8x8xf32>,
    return
  }
  func.func @transform_0(%arg0: i32) -> (i32, i32) {
    %c0_i32 = arith.constant 0 : i32
    %c0_i32_0 = arith.constant 0 : i32
    return %arg0, %c0_i32 : i32, i32
  }
  func.func @transform_1(%arg0: i32) -> (i32, i32, i32) {
    %c0_i32 = arith.constant 0 : i32
    %c0_i32_0 = arith.constant 0 : i32
    %c0_i32_1 = arith.constant 0 : i32
    return %arg0, %c0_i32, %c0_i32_0 : i32, i32, i32
  }
  func.func @transform_2(%arg0: i32) -> (i32, i32) {
    %c0_i32 = arith.constant 0 : i32
    %c0_i32_0 = arith.constant 0 : i32
    %c0_i32_1 = arith.constant 0 : i32
    return %c0_i32, %c0_i32_0 : i32, i32
  }
  func.func @transform_3(%arg0: i32) -> (i32, i32) {
    %c0_i32 = arith.constant 0 : i32
    %c0_i32_0 = arith.constant 0 : i32
    %c0_i32_1 = arith.constant 0 : i32
    return %c0_i32, %c0_i32_0 : i32, i32
  }
  func.func @transform_4(%arg0: i32) -> (i32, i32) {
    %c0_i32 = arith.constant 0 : i32
    %c0_i32_0 = arith.constant 0 : i32
    %c0_i32_1 = arith.constant 0 : i32
    return %c0_i32, %c0_i32_0 : i32, i32
  }
  func.func @transform_5(%arg0: i32) -> (i32, i32) {
    %c0_i32 = arith.constant 0 : i32
    %c0_i32_0 = arith.constant 0 : i32
    %c0_i32_1 = arith.constant 0 : i32
    return %c0_i32, %c0_i32_0 : i32, i32
  }
  func.func @transform_6(%arg0: i32) -> (i32, i32) {
    %c0_i32 = arith.constant 0 : i32
    %c0_i32_0 = arith.constant 0 : i32
    return %arg0, %c0_i32 : i32, i32
  }
  func.func @transform_7(%arg0: i32) -> (i32, i32) {
    %c0_i32 = arith.constant 0 : i32
    %c0_i32_0 = arith.constant 0 : i32
    return %arg0, %c0_i32 : i32, i32
  }
}

</mosaic_0001>

<bundles_post_ra>
// kernel: tpu_custom_call.1
= control target key start
LH: loop header
LB: loop body
LE: loop exit
PB: predicated region body
PF: predicated region fallthrough
CT: control target
= control target key end

     0   :  { %s3949_s0 = inlined_call_operand.hbm [shape: f32[16,32], index: 0, kind: input, shape index: {}]   ;;  %s3950_s1 = inlined_call_operand.hbm [shape: f32[16,8,32], index: 1, kind: input, shape index: {}]   ;;  %s3951_s2 = inlined_call_operand.hbm [shape: f32[32,32], index: 2, kind: input, shape index: {}]   ;;  %s3952_s3 = inlined_call_operand.hbm [shape: f32[32,32], index: 3, kind: input, shape index: {}]   ;;  %s3953_s4 = inlined_call_operand.vmem [shape: f32[1,32], index: 4, kind: input, shape index: {}]   ;;  %s3954_s5 = inlined_call_operand.vmem [shape: f32[1,32], index: 5, kind: input, shape index: {}]   ;;  %s3955_s6 = inlined_call_operand.hbm [shape: f32[16,32], index: 6, kind: output, shape index: {0}]   ;;  %s3956_s7 = inlined_call_operand.vmem [shape: f32[16,8], index: 7, kind: output, shape index: {1}]  }
   0x1   :  { %3962 = sst [smem:[#allocation16_spill]] %s3949_s0 }
   0x2   :  { %3963 = sst [smem:[#allocation17_spill]] %s3951_s2 }
   0x3   :  { %3964 = sst [smem:[#allocation18_spill]] %s3952_s3 }
   0x4   :  { %13 = vsyncpa [#allocation3], 0 }
   0x5   :  { %15 = vsyncpa [#allocation3 + $0x1], 0 }
   0x6   :  { %16 = vsyncpa [#allocation6], 0 }
   0x7   :  { %18 = vsyncpa [#allocation6 + $0x1], 0 }
   0x8   :  { %19 = vsyncpa [#allocation9], 0 }
   0x9   :  { %20 = vsyncpa [#allocation4], 0 }
   0xa   :  { %22 = vsyncpa [#allocation4 + $0x1], 0  ;;  %s3227_s24 = smov 0   ;;  %s3229_s25 = smov 0  }
   0xb   :  { %s3231_s26 = smov 0   ;;  %s3233_s27 = smov 0  }
   0xc LB: > { %s3248_s28 = sadd.s32 4294967295, %s3173_s27   ;;  %s2413_s29 = sadd.s32 4294967294, %s3173_s27   ;;  %s3173_s27 = sphi %s3233_s27, %s3989_s27   ;;  %s3169_s26 = sphi %s3231_s26, %s3988_s26   ;;  %s3165_s25 = sphi %s3229_s25, %s3987_s25   ;;  %s3161_s24 = sphi %s3227_s24, %s3986_s24  }
   0xd   : > { %p48_p0 = scmp.ne.s32.totalorder %s3165_s25, %s3161_s24  ;;  %p3957_p1 = scmp.eq.s32.totalorder %s3248_s28, 0 }
   0xe   : > { %p188_p3 = scmp.eq.s32.totalorder %s2413_s29, 1  ;;  %p2414_p5 = scmp.ge.s32.totalorder %s3173_s27, 1 }
   0xf   : > { %p3257_p4 = por %p3957_p1, %p48_p0  ;;  %p221_p7 = scmp.lt.s32.totalorder %s3173_s27, 3 }
  0x10   : > { %p3262_p6 = por %p188_p3, %p48_p0  ;;  %s3175_s10 = smov [#allocation7]  }
  0x11   : > { %s3965_s30 = scalar_select %p3257_p4, 1, 0 }
  0x12   : > { %s3966_s8 = scalar_select %p3262_p6, 1, 0 }
  0x13   : > { %p3267_p8 = pnand %p2414_p5, %p221_p7  ;;  %s233_s11 = sshll.u32 %s3175_s10, 4  ;;  %s3271_s11 = int_to_ptr.vmem [resolvable:$true] %s233_s11 }
  0x14   : > { %s3176_s13 = smov [#allocation8]   ;;  %s3969_s2 = sld [smem:[#allocation17_spill]] }
  0x15   : > { %p2878_p9 = pneg %p3267_p8  ;;  %s246_s14 = sshll.u32 %s3176_s13, 4  ;;  %s3282_s14 = int_to_ptr.vmem [resolvable:$true] %s246_s14 }
  0x17   : > { %p3278_p11 = pnand %p2878_p9, %p3957_p1 }
  0x19   : > { %p2981_p13 = pneg %p3278_p11 }
  0x1a   : > { %s2979_s17 = scalar_lea.hbm %s3969_s2, 512 }
  0x1b   : > { %p2980_p12 = scmp.ne.s32.totalorder %s3969_s2, %s2979_s17  ;;  %p2986_p5 = scmp.lt.u32.totalorder %s2979_s17, %s3969_s2 }
  0x1d   : > { %p2982_p0 = pnand %p2981_p13, %p2980_p12 }
  0x1f   : > { %p2983_p3 = pneg %p2982_p0 }
  0x21   : > { %p2988_p7 = pnand %p2986_p5, %p2983_p3 }
  0x23   : > { %2991 = shalt.err (!%p2988_p7)
}
  0x24   : > { %s2992_s22 = scalar_lea.vmem %s3271_s11, 512  ;;  %p3000_p2 = scmp.lt.s32.totalorder %s3271_s11, %s3271_s11 }
  0x25   : > { %p2993_p9 = scmp.ne.s32.totalorder %s3271_s11, %s2992_s22  ;;  %p3001_p12 = scmp.lt.s32.totalorder %s2992_s22, %s2992_s22 }
  0x27   : > { %p2995_p10 = pnand %p2993_p9, %p2981_p13  ;;  %p3002_p0 = por %p3001_p12, %p3000_p2 }
  0x29   : > { %p2996_p1 = pneg %p2995_p10 }
  0x2b   : > { %p3003_p6 = pnand %p3002_p0, %p2996_p1 }
  0x2d   : > { %3006 = shalt.err (!%p3003_p6)
}
  0x2e   : > { %s3958_s23 = smov 128   ;;  %s3959_s29 = smov 8  }
  0x2f   : > { %2881 = dma.hbm_to_vmem [thread:$0]  (!%p3278_p11), %s3969_s2, 512, %s3271_s11, [#allocation6], %s3958_s23, %s3958_s23, %s3959_s29  }
  0x30   : > { %s3970_s3 = sld [smem:[#allocation18_spill]] }
  0x36   : > { %s3007_s17 = scalar_lea.hbm %s3970_s3, 512 }
  0x37   : > { %p3008_p1 = scmp.ne.s32.totalorder %s3970_s3, %s3007_s17  ;;  %p3014_p10 = scmp.lt.u32.totalorder %s3007_s17, %s3970_s3 }
  0x39   : > { %p3010_p2 = pnand %p3008_p1, %p2981_p13 }
  0x3b   : > { %p3011_p6 = pneg %p3010_p2 }
  0x3d   : > { %p3016_p3 = pnand %p3014_p10, %p3011_p6 }
  0x3f   : > { %3019 = shalt.err (!%p3016_p3)
}
  0x40   : > { %s3020_s11 = scalar_lea.vmem %s3282_s14, 512  ;;  %p3028_p12 = scmp.lt.s32.totalorder %s3282_s14, %s3282_s14 }
  0x41   : > { %p3021_p5 = scmp.ne.s32.totalorder %s3282_s14, %s3020_s11  ;;  %p3029_p0 = scmp.lt.s32.totalorder %s3020_s11, %s3020_s11 }
  0x43   : > { %p3023_p7 = pnand %p3021_p5, %p2981_p13  ;;  %p3030_p1 = por %p3029_p0, %p3028_p12 }
  0x45   : > { %p3024_p9 = pneg %p3023_p7 }
  0x47   : > { %p3031_p2 = pnand %p3030_p1, %p3024_p9 }
  0x49   : > { %3034 = shalt.err (!%p3031_p2)
}
  0x4a   : > { %2884 = dma.hbm_to_vmem [thread:$0]  (!%p3278_p11), %s3970_s3, 512, %s3282_s14, [#allocation9], %s3958_s23, %s3958_s23, %s3959_s29  }
  0x4b   : > { %s3343_s12 = sadd.s32 1, %s3173_s27   ;;  %s35_s13 = sadd.s32 1, %s3169_s26 }
  0x4c   : > { %s32_s15 = ssub.s32 %s3173_s27, %s3343_s12  ;;  %p42_p13 = scmp.ne.s32.totalorder %s3169_s26, %s3165_s25 }
  0x4d   : > { %p33_p6 = scmp.eq.s32.totalorder %s32_s15, 0  ;;  %p43_p10 = scmp.eq.s32.totalorder %s3173_s27, 0 }
  0x4e   : > { %p3971_p3 = scmp.eq.s32.totalorder %s3248_s28, 1  ;;  %p2898_p7 = scmp.lt.s32.totalorder %s3173_s27, 2 }
  0x4f   : > { %s3359_s17 = scalar_select %p33_p6, %s3169_s26, %s35_s13  }
  0x50   : > { %p3353_p5 = por %p3971_p3, %p42_p13  ;;  %p44_p9 = por %p43_p10, %p42_p13 }
  0x51   : > { %s3362_s18 = sand.u32 1, %s3169_s26   ;;  %s2419_s19 = sshll.u32 %s3173_s27, 7 }
  0x52   : > { %s3972_s16 = scalar_select %p3353_p5, 1, 0 }
  0x53   : > { %s2418_s14 = sshll.u32 %s3362_s18, 3  ;;  %s3973_s0 = sld [smem:[#allocation16_spill]] }
  0x54   : > { %s270_s22 = scalar_lea.vmem [#allocation2], %s2418_s14  ;;  %p3373_p11 = pnand %p2898_p7, %p44_p9 }
  0x55   : > { %s277_s10 = sshll.u32 %s270_s22, 4  ;;  %s2420_s15 = sshll.u32 %s3362_s18, 6  ;;  %s3371_s10 = int_to_ptr.vmem [resolvable:$true] %s277_s10 }
  0x56   : > { %s267_s29 = scalar_lea.sflag [#allocation3], %s3362_s18  ;;  %p3037_p0 = pneg %p3373_p11 }
  0x59   : > { %s3369_s11 = scalar_lea.hbm %s3973_s0, %s2419_s19  ;;  %s3040_s21 = scalar_lea.hbm %s3973_s0, 256 }
  0x5a   : > { %s3035_s20 = scalar_lea.hbm %s3369_s11, 128  ;;  %p3041_p13 = scmp.lt.u32.totalorder %s3369_s11, %s3973_s0 }
  0x5b   : > { %p3036_p12 = scmp.ne.s32.totalorder %s3369_s11, %s3035_s20  ;;  %p3042_p6 = scmp.lt.u32.totalorder %s3040_s21, %s3035_s20 }
  0x5c   : > { %p3044_p3 = scmp.lt.u32.totalorder %s3035_s20, %s3369_s11 }
  0x5d   : > { %p3038_p1 = pnand %p3037_p0, %p3036_p12  ;;  %p3043_p10 = por %p3042_p6, %p3041_p13 }
  0x5f   : > { %p3039_p2 = pneg %p3038_p1  ;;  %p3045_p7 = por %p3044_p3, %p3043_p10 }
  0x61   : > { %p3046_p9 = pnand %p3045_p7, %p3039_p2 }
  0x63   : > { %3049 = shalt.err (!%p3046_p9)
}
  0x64   : > { %s3050_s23 = scalar_lea.vmem %s3371_s10, 128  ;;  %s3179_s14 = smov [#allocation2]  }
  0x65   : > { %p3051_p12 = scmp.ne.s32.totalorder %s3371_s10, %s3050_s23  ;;  %s3055_s19 = sshll.u32 %s3179_s14, 4  ;;  %s3056_s19 = int_to_ptr.vmem [resolvable:$false] %s3055_s19 }
  0x66   : > { %s3057_s2 = scalar_lea.vmem %s3056_s19, 256  ;;  %p3058_p4 = scmp.lt.s32.totalorder %s3371_s10, %s3056_s19 }
  0x67   : > { %p3053_p1 = pnand %p3051_p12, %p3037_p0  ;;  %p3059_p13 = scmp.lt.s32.totalorder %s3057_s2, %s3050_s23 }
  0x69   : > { %p3054_p5 = pneg %p3053_p1  ;;  %p3060_p6 = por %p3059_p13, %p3058_p4 }
  0x6b   : > { %p3061_p10 = pnand %p3060_p6, %p3054_p5 }
  0x6d   : > { %3064 = shalt.err (!%p3061_p10)
}
  0x6e   : > { %2888 = dma.hbm_to_vmem [thread:$0]  (!%p3373_p11), %s3369_s11, 128, %s3371_s10, %s267_s29  }
  0x6f   : > { %s288_s20 = scalar_lea.vmem [#allocation5], %s2420_s15  ;;  %s2436_s22 = sshll.u32 %s3173_s27, 10 }
  0x70   : > { %s295_s21 = sshll.u32 %s288_s20, 4  ;;  %s3413_s19 = scalar_lea.hbm %s3950_s1, %s2436_s22  ;;  %s3407_s21 = int_to_ptr.vmem [resolvable:$true] %s295_s21 }
  0x71   : > { %s3975_s2 = sand.u32 1, %s3173_s27   ;;  %s3065_s3 = scalar_lea.hbm %s3413_s19, 1024 }
  0x72   : > { %s3417_s0 = scalar_lea.sflag [#allocation6], %s3975_s2  ;;  %p3066_p4 = scmp.ne.s32.totalorder %s3413_s19, %s3065_s3 }
  0x73   : > { %s3070_s11 = scalar_lea.hbm %s3950_s1, 2048  ;;  %p3071_p3 = scmp.lt.u32.totalorder %s3413_s19, %s3950_s1 }
  0x74   : > { %p3068_p5 = pnand %p3066_p4, %p3037_p0  ;;  %p3072_p7 = scmp.lt.u32.totalorder %s3070_s11, %s3065_s3 }
  0x75   : > { %p3074_p12 = scmp.lt.u32.totalorder %s3065_s3, %s3413_s19 }
  0x76   : > { %p3069_p2 = pneg %p3068_p5  ;;  %p3073_p9 = por %p3072_p7, %p3071_p3 }
  0x78   : > { %p3075_p1 = por %p3074_p12, %p3073_p9 }
  0x7a   : > { %p3076_p13 = pnand %p3075_p1, %p3069_p2 }
  0x7c   : > { %3079 = shalt.err (!%p3076_p13)
}
  0x7d   : > { %s3080_s20 = scalar_lea.vmem %s3407_s21, 1024  ;;  %s3180_s22 = smov [#allocation5]  }
  0x7e   : > { %p3081_p6 = scmp.ne.s32.totalorder %s3407_s21, %s3080_s20  ;;  %s3085_s14 = sshll.u32 %s3180_s22, 4  ;;  %s3086_s14 = int_to_ptr.vmem [resolvable:$false] %s3085_s14 }
  0x7f   : > { %s3087_s23 = scalar_lea.vmem %s3086_s14, 2048  ;;  %p3088_p5 = scmp.lt.s32.totalorder %s3407_s21, %s3086_s14 }
  0x80   : > { %p3083_p10 = pnand %p3081_p6, %p3037_p0  ;;  %p3089_p3 = scmp.lt.s32.totalorder %s3087_s23, %s3080_s20 }
  0x82   : > { %p3084_p4 = pneg %p3083_p10  ;;  %p3090_p7 = por %p3089_p3, %p3088_p5 }
  0x84   : > { %p3091_p9 = pnand %p3090_p7, %p3084_p4 }
  0x86   : > { %3094 = shalt.err (!%p3091_p9)
}
  0x87   : > { %s3976_s3 = smov 8   ;;  %s3977_s2 = smov 128  }
  0x88   : > { %2891 = dma.hbm_to_vmem [thread:$0]  (!%p3373_p11), %s3413_s19, 1024, %s3407_s21, %s3417_s0, %s3977_s2, %s3977_s2, %s3976_s3  }
  0x89   : > { %307 = sbr.rel (%p3267_p8) target bundleno = 1285 (0x505), region = 44  ;;  %s3449_s29 = sand.u32 (!%p3267_p8), 1, %s3165_s25  }
  0x8a   : > { %s2424_s18 = sshll.u32 (!%p3267_p8), %s3449_s29, 3  ;;  %s310_s11 = scalar_lea.sflag (!%p3267_p8), [#allocation3], %s3449_s29 }
  0x8b   : > { %s313_s13 = scalar_lea.vmem (!%p3267_p8), [#allocation2], %s2424_s18  ;;  %p3978_p0 = scmp.ne.s32.totalorder (!%p3267_p8), %s3965_s30, 0 }
  0x90   : > { %3140 = dma.done.wait (%p3978_p0), %s310_s11, 128  }
  0x91   : > { %3142 = vsyncadd (%p3978_p0), %s310_s11, 4294967168  ;;  %s318_s0 = sand.u32 1, %s3248_s28   ;;  %s2425_s9 = sshll.u32 %s3449_s29, 6 }
  0x92   : > { %s319_s21 = scalar_lea.sflag [#allocation6], %s318_s0  ;;  %s3461_s19 = scalar_lea.vmem [#allocation5], %s2425_s9 }
  0x93   : > { %3144 = dma.done.wait (%p3978_p0), %s319_s21, 1024  }
  0x94   : > { %3146 = vsyncadd (%p3978_p0), %s319_s21, 4294966272  ;;  %p3979_p8 = scmp.eq.s32.totalorder %s3248_s28, 0 }
  0x96   : > { %3148 = dma.done.wait (%p3979_p8), [#allocation6], 512   ;;  %p3980_p11 = pmov %p3979_p8 }
  0x97   : > { %p3981_p2 = pmov %p3979_p8 }
  0x98   : > { %3150 = vsyncadd (%p3980_p11), [#allocation6], 4294966784 }
  0x99   : > { %3152 = dma.done.wait (%p3981_p2), [#allocation9], 512   ;;  %p3982_p12 = pmov %p3981_p2 }
  0x9a   : > { %v3181_v0 = vmov 0.0|0.0   ;;  %vm3182_vm0 = vmmov 0   ;;  %v3183_v1 = vmov 0.0   ;;  %vm395_vm1 = vcmask 261120   ;;  %v384_v2 = vld [vmem:[#allocation7] sm:$0xff]  ;;  %v385_v3 = vld [vmem:[#allocation7 + $0x8] sm:$0xff] }
  0x9b   : > { %3154 = vsyncadd (%p3982_p12), [#allocation9], 4294966784  ;;  %2725 = vmatprep.subr.bf16.mxu0 %v3181_v0  ;;  %2547 = vmatprep.mubr.msk.f32.mxu0 %vm3182_vm0, %v3183_v1  ;;  %v386_v4 = vld [vmem:[#allocation7 + $0x10] sm:$0xff]  ;;  %v400_v5 = vand.u32 4294901760, %v384_v2  ;;  %v403_v6 = vand.u32 4294901760, %v385_v3  ;;  %v387_v7 = vld [vmem:[#allocation7 + $0x18] sm:$0xff] }
  0x9c   : > { %v406_v8 = vand.u32 4294901760, %v386_v4  ;;  %v375_v9 = vld [vmem:[%s313_s13] sm:$0xff]  ;;  %v3478_v10 = vld [vmem:[#allocation8] sm:$0xff]  ;;  %v409_v11 = vand.u32 4294901760, %v387_v7  ;;  %v3481_v13 = vld [vmem:[#allocation8 + $0x8] sm:$0xff]  ;;  %vm1885_vm2 = vcmask 1041409  }
  0x9d   : > { %v397_v12 = vsel %vm395_vm1, %v375_v9, 0  ;;  %v913_v14 = vand.u32 4294901760, %v3478_v10  ;;  %v3484_v15 = vpack.c.bf16 %v403_v6, %v400_v5  ;;  %v3486_v16 = vsub.f32 %v384_v2, %v400_v5  ;;  %v3492_v19 = vld [vmem:[#allocation8 + $0x10] sm:$0xff]  ;;  %v3510_v28 = vld [vmem:[#allocation8 + $0x18] sm:$0xff]  ;;  %v3540_v41 = vld [vmem:[%s3461_s19 + $0x20] sm:$0xff]  ;;  %p371_p1 = scmp.lt.s32.totalorder %s3248_s28, 1 }
  0x9e   : > { %v3488_v17 = vsub.f32 %v385_v3, %v403_v6  ;;  %v3490_v18 = vsub.f32 %v386_v4, %v406_v8  ;;  %v3494_v20 = vpack.c.bf16 %v409_v11, %v406_v8  ;;  %v3496_v21 = vsub.f32 %v387_v7, %v409_v11  ;;  %v3583_v63 = vld [vmem:[%s3461_s19 + $0x28] sm:$0xff]  ;;  %v3588_v3 = vld [vmem:[%s3461_s19 + $0x30] sm:$0xff]  ;;  %v3593_v5 = vld [vmem:[%s3461_s19] sm:$0xff]  ;;  %s2433_s11 = sshll.u32 %s3248_s28, 7  ;;  %s363_s13 = scalar_lea.vmem [#allocation10], %s2424_s18 }
  0x9f   : > { %v3498_v22 = vand.u32 4294901760, %v397_v12  ;;  %v916_v23 = vand.u32 4294901760, %v3481_v13  ;;  %2727 = vmatpush3.bf16.msra.mxu0 %v3484_v15  ;;  %v481_v24 = vand.u32 4294901760, %v3486_v16  ;;  %v3507_v26 = vsub.f32 %v3478_v10, %v913_v14  ;;  %s3867_s22 = scalar_select %p371_p1, %s3248_s28, 1 }
  0xa0   : > { %v488_v25 = vand.u32 4294901760, %v3488_v17  ;;  %v495_v27 = vand.u32 4294901760, %v3490_v18  ;;  %2728 = vmatprep.subr.bf16.mxu0 %v3181_v0  ;;  %v502_v31 = vand.u32 4294901760, %v3496_v21  ;;  %v919_v32 = vand.u32 4294901760, %v3492_v19  ;;  %s2274_s0 = sshll.u32 %s363_s13, 4  ;;  %s2257_s28 = scalar_lea.sflag [#allocation4], %s3449_s29  ;;  %s3905_s0 = int_to_ptr.vmem [resolvable:$true] %s2274_s0 }
  0xa1   : > { %v3514_v29 = vsub.f32 %v397_v12, %v3498_v22  ;;  %v3519_v30 = vsub.f32 %v3481_v13, %v916_v23  ;;  %v482_v33 = vsub.f32 %v3486_v16, %v481_v24  ;;  %v1064_v35 = vand.u32 4294901760, %v3507_v26  ;;  %v3606_v12 = vld [vmem:[%s3461_s19 + $0x38] sm:$0xff]  ;;  %s2429_s14 = sshll.u32 %s3867_s22, 3  ;;  %s3095_s18 = scalar_lea.vmem %s3905_s0, 128 }
  0xa2   : > { %v489_v34 = vsub.f32 %v3488_v17, %v488_v25  ;;  %v496_v36 = vsub.f32 %v3490_v18, %v495_v27  ;;  %v503_v39 = vsub.f32 %v3496_v21, %v502_v31  ;;  %v922_v40 = vand.u32 4294901760, %v3510_v28  ;;  %s374_s2 = scalar_lea.vmem %s3956_s7, %s2429_s14  ;;  %p3096_p13 = scmp.ne.s32.totalorder %s3905_s0, %s3095_s18 }
  0xa3   : > { %v470_v37 = vand.u32 4294901760, %v3514_v29  ;;  %v1071_v38 = vand.u32 4294901760, %v3519_v30  ;;  %2730 = vmatpush3.bf16.msra.mxu0 %v3494_v20  ;;  %v483_v42 = vand.u32 4294901760, %v482_v33  ;;  %v1065_v44 = vsub.f32 %v3507_v26, %v1064_v35  ;;  %v3609_v33 = vld [vmem:[%s3461_s19 + $0x8] sm:$0xff]  ;;  %p3983_p6 = scmp.ne.s32.totalorder %s3972_s16, 0  ;;  %s3186_s30 = smov [#allocation10]  }
  0xa4   : > { %v490_v43 = vand.u32 4294901760, %v489_v34  ;;  %v497_v45 = vand.u32 4294901760, %v496_v36  ;;  %2731 = vmatprep.subr.bf16.mxu0 %v3181_v0  ;;  %v504_v48 = vand.u32 4294901760, %v503_v39  ;;  %v3556_v49 = vsub.f32 %v3492_v19, %v919_v32  ;;  %v3615_v36 = vld [vmem:[%s3461_s19 + $0x10] sm:$0xff]  ;;  %s3099_s10 = sshll.u32 %s3186_s30, 4  ;;  %s3100_s10 = int_to_ptr.vmem [resolvable:$false] %s3099_s10 }
  0xa5   : > { %v471_v46 = vsub.f32 %v3514_v29, %v470_v37  ;;  %v1072_v47 = vsub.f32 %v3519_v30, %v1071_v38  ;;  %v1066_v51 = vand.u32 4294901760, %v1065_v44  ;;  %v3561_v52 = vsub.f32 %v3510_v28, %v922_v40  ;;  %p3097_p10 = pnand %p3096_p13, %p3983_p6  ;;  %s3101_s15 = scalar_lea.vmem %s3100_s10, 256 }
  0xa6   : > { %v2732_v50 = vpack.c.bf16 %v490_v43, %v483_v42  ;;  %v3565_v53 = vsel %vm395_vm1, %v3540_v41, 0  ;;  %v1078_v56 = vand.u32 4294901760, %v3556_v49  ;;  %v2735_v61 = vpack.c.bf16 %v504_v48, %v497_v45  ;;  %p3102_p5 = scmp.lt.s32.totalorder %s3905_s0, %s3100_s10  ;;  %p3103_p3 = scmp.lt.s32.totalorder %s3101_s15, %s3095_s18 }
  0xa7   : > { %v472_v54 = vand.u32 4294901760, %v471_v46  ;;  %v1073_v55 = vand.u32 4294901760, %v1072_v47  ;;  %v1085_v57 = vand.u32 4294901760, %v3561_v52  ;;  %v3570_v58 = vand.u32 4294901760, %v3565_v53  ;;  %p3098_p4 = pneg %p3097_p10 }
  0xa8   : > { %v1079_v60 = vsub.f32 %v3556_v49, %v1078_v56  ;;  %v904_v6 = vsel %vm395_vm1, %v3583_v63, 0  ;;  %v2738_v8 = vpack.c.bf16 %v3488_v17, %v3486_v16  ;;  %v2777_v9 = vpack.c.bf16 %v3519_v30, %v3507_v26  ;;  %p3104_p7 = por %p3103_p3, %p3102_p5 }
  0xa9   : > { %2548 = vmatmul.mubr.f32.vlgmr.msra.gmra.mrb[0].mxu0 %v472_v54  ;;  %v3572_v59 = vpack.c.bf16 %v1073_v55, %v1066_v51  ;;  %v1086_v62 = vsub.f32 %v3561_v52, %v1085_v57  ;;  %2639 = vmatprep.mubr.f32.mxu1 %v3570_v58  ;;  %v907_v11 = vsel %vm395_vm1, %v3588_v3, 0  ;;  %v889_v34 = vsel %vm395_vm1, %v3593_v5, 0 }
  0xaa   : > { %2733 = vmatpush3.bf16.msra.mxu0 %v2732_v50  ;;  %2558 = vmatprep.mubr.msk.f32.mxu0 %vm3182_vm0, %v3183_v1  ;;  %v1080_v2 = vand.u32 4294901760, %v1079_v60  ;;  %v3618_v39 = vand.u32 4294901760, %v904_v6  ;;  %v3622_v42 = vand.u32 4294901760, %v907_v11  ;;  %v910_v43 = vsel %vm395_vm1, %v3606_v12, 0  ;;  %v3637_v50 = vld [vmem:[%s3461_s19 + $0x18] sm:$0xff]  ;;  %s3903_s19 = scalar_lea.hbm %s3955_s6, %s2433_s11  ;;  %p3105_p9 = pnand %p3104_p7, %p3098_p4 }
  0xab   : > { %2809 = vmatprep.subr.bf16.mxu1 %v3572_v59  ;;  %2734 = vmatprep.subr.bf16.mxu0 %v3181_v0  ;;  %v1087_v4 = vand.u32 4294901760, %v1086_v62  ;;  %v892_v44 = vsel %vm395_vm1, %v3609_v33, 0  ;;  %v2741_v45 = vpack.c.bf16 %v3496_v21, %v3490_v18  ;;  %v2781_v46 = vpack.c.bf16 %v3561_v52, %v3556_v49 }
  0xac   : > { %2811 = vmatpush3.bf16.msra.mxu1 %v3572_v59  ;;  %v3632_v47 = vand.u32 4294901760, %v889_v34  ;;  %v895_v48 = vsel %vm395_vm1, %v3615_v36, 0  ;;  %v3643_v51 = vand.u32 4294901760, %v910_v43  ;;  %v3645_v54 = vand.u32 4294901760, %v892_v44 }
  0xad   : > { %v3597_v7 = vpack.c.bf16 %v1087_v4, %v1080_v2  ;;  %v3648_v55 = vand.u32 4294901760, %v895_v48  ;;  %v898_v60 = vsel %vm395_vm1, %v3637_v50, 0  ;;  %v3658_v62 = vpack.c.bf16 %v916_v23, %v913_v14 }
  0xae   : > { %2736 = vmatpush3.bf16.msra.mxu0 %v2735_v61  ;;  %v982_v61 = vsub.f32 %v889_v34, %v3632_v47  ;;  %v992_v2 = vsub.f32 %v892_v44, %v3645_v54  ;;  %v3662_v4 = vand.u32 4294901760, %v898_v60  ;;  %v3671_v10 = vpack.c.bf16 %v922_v40, %v919_v32 }
  0xaf   : > { %2737 = vmatprep.subr.bf16.mxu0 %v3181_v0  ;;  %2810 = vmatprep.subr.bf16.mxu1 %v3597_v7  ;;  %v1022_v14 = vsub.f32 %v3565_v53, %v3570_v58  ;;  %v2750_v19 = vpack.c.bf16 %v488_v25, %v481_v24  ;;  %v1032_v23 = vsub.f32 %v904_v6, %v3618_v39  ;;  %vm1887_vm3 = vcmask 1042434  }
  0xb0   : > { %2812 = vmatpush3.bf16.msra.mxu1 %v3597_v7  ;;  %v1012_v13 = vsub.f32 %v898_v60, %v3662_v4  ;;  %v2793_v28 = vpack.c.bf16 %v1071_v38, %v1064_v35  ;;  %v1042_v16 = vsub.f32 %v907_v11, %v3622_v42  ;;  %v2753_v17 = vpack.c.bf16 %v502_v31, %v495_v27 }
  0xb1   : > { %2559 = vmatmul.mubr.f32.vlgmr.msra.gmra.mrb[0].mxu0 %v3498_v22  ;;  %2778 = vmatprep.subr.bf16.mxu1 %v2777_v9  ;;  %v1052_v24 = vsub.f32 %v910_v43, %v3643_v51  ;;  %v983_v25 = vand.u32 4294901760, %v982_v61  ;;  %v993_v26 = vand.u32 4294901760, %v992_v2  ;;  %v2797_v21 = vpack.c.bf16 %v1085_v57, %v1078_v56 }
  0xb2   : > { %2739 = vmatpush3.bf16.msra.mxu0 %v2738_v8  ;;  %2569 = vmatprep.mubr.msk.f32.mxu0 %vm3182_vm0, %v3183_v1  ;;  %v1002_v8 = vsub.f32 %v895_v48, %v3648_v55  ;;  %v1023_v30 = vand.u32 4294901760, %v1022_v14  ;;  %v1043_v31 = vand.u32 4294901760, %v1042_v16  ;;  %v3184_v11 = vmov 1966171168  }
  0xb3   : > { %2740 = vmatprep.subr.bf16.mxu0 %v3181_v0  ;;  %2640 = vmatmul.mubr.f32.vlgmr.msra.gmra.mrb[0].mxu1 %v3618_v39  ;;  %v984_v27 = vsub.f32 %v982_v61, %v983_v25  ;;  %v994_v32 = vsub.f32 %v992_v2, %v993_v26  ;;  %v1701_v34 = vunpack.c.l.s4 %v3184_v11  ;;  %v1703_v43 = vlaneseq }
  0xb4   : > { %2780 = vmatpush3.bf16.msra.mxu1 %v2777_v9  ;;  %2642 = vmatprep.mubr.f32.mxu1 %v3622_v42  ;;  %v1003_v18 = vand.u32 4294901760, %v1002_v8  ;;  %v1024_v38 = vsub.f32 %v1022_v14, %v1023_v30  ;;  %v1044_v53 = vsub.f32 %v1042_v16, %v1043_v31  ;;  %vm1889_vm4 = vcmask 1043459  }
  0xb5   : > { %2782 = vmatprep.subr.bf16.mxu1 %v2781_v46  ;;  %v995_v35 = vand.u32 4294901760, %v994_v32  ;;  %v1702_v44 = vunpack.c.0.s8 %v1701_v34  ;;  %vm1891_vm5 = vcmask 1044484   ;;  %vm1893_vm6 = vcmask 1045509  }
  0xb6   : > { %2742 = vmatpush3.bf16.msra.mxu0 %v2741_v45  ;;  %v1025_v52 = vand.u32 4294901760, %v1024_v38  ;;  %v1045_v6 = vand.u32 4294901760, %v1044_v53  ;;  %v3750_v45 = vshrl.u32 %v1703_v43, 7  ;;  %vm1895_vm7 = vcmask 1046534  }
  0xb7   : > { %2743 = vmatprep.subr.bf16.mxu0 %v3181_v0  ;;  %2643 = vmatmul.mubr.f32.gmra.mrb[2].mxu1 %v3643_v51  ;;  %vm1897_vm8 = vcmask 1047559   ;;  %vm1900_vm9 = vcmask 64512  }
  0xb8   : > { %2784 = vmatpush3.bf16.msra.mxu1 %v2781_v46  ;;  %2653 = vmatprep.mubr.f32.mxu1 %v982_v61  ;;  %v2430_v46 = vld [vmem:[%s3953_s4] ss:$0 sm:$0xff] }
  0xb9   : > { %2570 = vmatmul.mubr.f32.vlgmr.msra.gmra.mrb[0].mxu0 %v3514_v29  ;;  %2786 = vmatprep.subr.bf16.mxu1 %v3658_v62  ;;  %v1013_v29 = vand.u32 4294901760, %v1012_v13 }
  0xba   : > { %2745 = vmatpush3.bf16.msra.mxu0 %v3484_v15  ;;  %2580 = vmatprep.mubr.msk.f32.mxu0 %vm3182_vm0, %v3183_v1 }
  0xbb   : > { %2746 = vmatprep.subr.bf16.mxu0 %v3181_v0  ;;  %2654 = vmatmul.mubr.f32.vlgmr.msra.gmra.mrb[4].mxu1 %v992_v2 }
  0xbc   : > { %2788 = vmatpush3.bf16.msra.mxu1 %v3658_v62  ;;  %2656 = vmatprep.mubr.f32.mxu1 %v1002_v8 }
  0xbd   : > { %2790 = vmatprep.subr.bf16.mxu1 %v3671_v10 }
  0xbe   : > { %2748 = vmatpush3.bf16.msra.mxu0 %v3494_v20 }
  0xbf   : > { %2749 = vmatprep.subr.bf16.mxu0 %v3181_v0  ;;  %2657 = vmatmul.mubr.f32.gmra.mrb[6].mxu1 %v1012_v13 }
  0xc0   : > { %2659 = vmatprep.mubr.f32.mxu1 %v1022_v14  ;;  %2792 = vmatpush3.bf16.msra.mxu1 %v3671_v10 }
  0xc1   : > { %2581 = vmatmul.mubr.f32.vlgmr.msra.gmra.mrb[0].mxu0 %v470_v37  ;;  %2794 = vmatprep.subr.bf16.mxu1 %v2793_v28  ;;  %v1014_v37 = vsub.f32 %v1012_v13, %v1013_v29 }
  0xc2   : > { %2751 = vmatpush3.bf16.msra.mxu0 %v2750_v19  ;;  %2591 = vmatprep.mubr.msk.f32.mxu0 %vm3182_vm0, %v3183_v1 }
  0xc3   : > { %2752 = vmatprep.subr.bf16.mxu0 %v3181_v0  ;;  %2660 = vmatmul.mubr.f32.gmra.mrb[0].mxu1 %v1032_v23  ;;  %v1015_v40 = vand.u32 4294901760, %v1014_v37 }
  0xc4   : > { %2662 = vmatprep.mubr.f32.mxu1 %v1042_v16 }
  0xc6   : > { %2754 = vmatpush3.bf16.msra.mxu0 %v2753_v17 }
  0xc7   : > { %2755 = vmatprep.subr.bf16.mxu0 %v3181_v0  ;;  %2663 = vmatmul.mubr.f32.gmra.mrb[2].mxu1 %v1052_v24 }
  0xc8   : > { %2673 = vmatprep.mubr.f32.mxu1 %v983_v25 }
  0xc9   : > { %2592 = vmatmul.mubr.f32.vlgmr.msra.gmra.mrb[0].mxu0 %v3498_v22 }
  0xca   : > { %2757 = vmatpush3.bf16.msra.mxu0 %v3484_v15  ;;  %2602 = vmatprep.mubr.msk.f32.mxu0 %vm3182_vm0, %v3183_v1  ;;  %v985_v15 = vand.u32 4294901760, %v984_v27  ;;  %v1033_v1 = vand.u32 4294901760, %v1032_v23 }
  0xcb   : > { %2758 = vmatprep.subr.bf16.mxu0 %v3181_v0  ;;  %2674 = vmatmul.mubr.f32.vlgmr.msra.gmra.mrb[4].mxu1 %v993_v26  ;;  %v1004_v0 = vsub.f32 %v1002_v8, %v1003_v18 }
  0xcc   : > { %2796 = vmatpush3.bf16.msra.mxu1 %v2793_v28  ;;  %2676 = vmatprep.mubr.f32.mxu1 %v1003_v18  ;;  %v1034_v49 = vsub.f32 %v1032_v23, %v1033_v1 }
  0xcd   : > { %2798 = vmatprep.subr.bf16.mxu1 %v2797_v21 }
  0xce   : > { %2760 = vmatpush3.bf16.msra.mxu0 %v3494_v20  ;;  %v1053_v20 = vand.u32 4294901760, %v1052_v24  ;;  %v1035_v56 = vand.u32 4294901760, %v1034_v49 }
  0xcf   : > { %2762 = vmatprep.subr.bf16.mxu0 %v3658_v62  ;;  %2677 = vmatmul.mubr.f32.gmra.mrb[6].mxu1 %v1013_v29 }
  0xd0   : > { %2679 = vmatprep.mubr.f32.mxu1 %v1023_v30  ;;  %2800 = vmatpush3.bf16.msra.mxu1 %v2797_v21  ;;  %v1054_v57 = vsub.f32 %v1052_v24, %v1053_v20 }
  0xd1   : > { %2603 = vmatmul.mubr.f32.vlgmr.msra.gmra.mrb[0].mxu0 %v3498_v22  ;;  %2802 = vmatprep.subr.bf16.mxu1 %v3658_v62  ;;  %v1005_v22 = vand.u32 4294901760, %v1004_v0 }
  0xd2   : > { %2764 = vmatpush3.bf16.msra.mxu0 %v3658_v62  ;;  %2613 = vmatprep.mubr.f32.mxu0 %v985_v15 }
  0xd3   : > { %2766 = vmatprep.subr.bf16.mxu0 %v3671_v10  ;;  %2680 = vmatmul.mubr.f32.gmra.mrb[0].mxu1 %v1033_v1 }
  0xd4   : > { %2682 = vmatprep.mubr.f32.mxu1 %v1043_v31 }
  0xd6   : > { %2768 = vmatpush3.bf16.msra.mxu0 %v3671_v10 }
  0xd7   : > { %2770 = vmatprep.subr.bf16.mxu0 %v3572_v59  ;;  %2683 = vmatmul.mubr.f32.gmra.mrb[2].mxu1 %v1053_v20 }
  0xd8   : > { %2693 = vmatprep.mubr.f32.mxu1 %v3632_v47 }
  0xd9   : > { %2614 = vmatmul.mubr.f32.vlgmr.msra.gmra.mrb[2].mxu0 %v995_v35 }
  0xda   : > { %2772 = vmatpush3.bf16.msra.mxu0 %v3572_v59  ;;  %2616 = vmatprep.mubr.f32.mxu0 %v1005_v22  ;;  %v1055_v59 = vand.u32 4294901760, %v1054_v57 }
  0xdb   : > { %2774 = vmatprep.subr.bf16.mxu0 %v3597_v7  ;;  %2694 = vmatmul.mubr.f32.vlgmr.msra.gmra.mrb[4].mxu1 %v3645_v54 }
  0xdc   : > { %2804 = vmatpush3.bf16.msra.mxu1 %v3658_v62  ;;  %2696 = vmatprep.mubr.f32.mxu1 %v3648_v55 }
  0xdd   : > { %2617 = vmatmul.mubr.f32.gmra.mrb[4].mxu0 %v1015_v40  ;;  %2806 = vmatprep.subr.bf16.mxu1 %v3671_v10 }
  0xde   : > { %2619 = vmatprep.mubr.f32.mxu0 %v1025_v52  ;;  %2776 = vmatpush3.bf16.msra.mxu0 %v3597_v7 }
  0xdf   : > { %2697 = vmatmul.mubr.f32.gmra.mrb[6].mxu1 %v3662_v4 }
  0xe0   : > { %2699 = vmatprep.mubr.f32.mxu1 %v3570_v58  ;;  %2808 = vmatpush3.bf16.msra.mxu1 %v3671_v10  ;;  %v3757_v10 = vsub.s32 0, %v3750_v45 }
  0xe1   : > { %2620 = vmatmul.mubr.f32.gmra.mrb[6].mxu0 %v1035_v56 }
  0xe2   : > { %2622 = vmatprep.mubr.f32.mxu0 %v1045_v6 }
  0xe3   : > { %2700 = vmatmul.mubr.f32.gmra.mrb[0].mxu1 %v3618_v39 }
  0xe4   : > { %2702 = vmatprep.mubr.f32.mxu1 %v3622_v42 }
  0xe5   : > { %2623 = vmatmul.mubr.f32.gmra.mrb[8].mxu0 %v1055_v59 }
  0xe6   : > { %2633 = vmatprep.mubr.f32.mxu0 %v3632_v47 }
  0xe7   : > { %2703 = vmatmul.mubr.f32.gmra.mrb[2].mxu1 %v3643_v51 }
  0xe8   : > { %2713 = vmatprep.mubr.f32.mxu1 %v3632_v47 }
  0xe9   : > { %2634 = vmatmul.mubr.f32.vlgmr.msra.gmra.mrb[2].mxu0 %v3645_v54 }
  0xea   : > { %2636 = vmatprep.mubr.f32.mxu0 %v3648_v55 }
  0xeb   : > { %2714 = vmatmul.mubr.f32.vlgmr.msra.gmra.mrb[4].mxu1 %v3645_v54 }
  0xec   : > { %2716 = vmatprep.mubr.f32.mxu1 %v3648_v55 }
  0xed   : > { %2637 = vmatmul.mubr.f32.gmra.mrb[4].mxu0 %v3662_v4 }
  0xef   : > { %2717 = vmatmul.mubr.f32.gmra.mrb[6].mxu1 %v3662_v4 }
  0xf0   : > { %2719 = vmatprep.mubr.f32.mxu1 %v3570_v58 }
  0xf3   : > { %2720 = vmatmul.mubr.f32.gmra.mrb[0].mxu1 %v3618_v39  ;;  %v1705_v39 = vsub.s32 %v1702_v44, %v3750_v45  ;;  %v2431_v44 = vld [vmem:[%s3954_s5] ss:$0 sm:$0xff] }
  0xf4   : > { %2722 = vmatprep.mubr.f32.mxu1 %v3622_v42 }
  0xf7   : > { %2723 = vmatmul.mubr.f32.gmra.mrb[2].mxu1 %v3643_v51 }
 0x1a4   : > { %v880_v7 = vpop.f32.mrb[0].mxu0 }
 0x1a5   : > { %v2604_v9 = vpop.f32.mrb[1].mxu0  ;;  %v2813_v58 = vadd.f32 %v2430_v46, %v880_v7 }
 0x1a7   : > { %v1706_v47 = vrot.slane %v2813_v58, %v1705_v39  ;;  %v1699_v51 = vcombine.high %v2813_v58, %v2813_v58 }
 0x1a9   : > { %v1714_v54 = vcombine.high %v1706_v47, %v1706_v47  ;;  %v1713_v61 = vrot.slane %v1699_v51, %v1705_v39  ;;  %v1722_v4 = vrot.slane %v1706_v47, %v1705_v39 }
 0x1ab   : > { %v1736_v2 = vrot.slane %v1714_v54, %v1705_v39  ;;  %v1715_v14 = vcombine.high %v1713_v61, %v1713_v61  ;;  %v1751_v25 = vrot.slane %v1722_v4, %v3757_v10  ;;  %v1744_v18 = vcombine.high %v1722_v4, %v1722_v4 }
 0x1ac   : > { %v1729_v20 = vrot.slane %v1713_v61, %v1705_v39 }
 0x1ad   : > { %v1755_v23 = vrot.slane %v1736_v2, %v3757_v10  ;;  %v1746_v17 = vcombine.high %v1736_v2, %v1736_v2  ;;  %v1743_v31 = vrot.slane %v1715_v14, %v1705_v39  ;;  %v1759_v0 = vrot.slane %v1744_v18, %v3757_v10 }
 0x1ae   : > { %v1767_v56 = vrot.slane %v1729_v20, %v3757_v10  ;;  %v1745_v57 = vcombine.high %v1729_v20, %v1729_v20 }
 0x1af   : > { %v1763_v15 = vrot.slane %v1746_v17, %v3757_v10  ;;  %v1771_v40 = vrot.slane %v1743_v31, %v3757_v10  ;;  %v1747_v52 = vcombine.high %v1743_v31, %v1743_v31 }
 0x1b0   : > { %v1775_v58 = vrot.slane %v1745_v57, %v3757_v10 }
 0x1b1   : > { %v1779_v11 = vrot.slane %v1747_v52, %v3757_v10 }
 0x1b4   : > { %v2621_v42 = vpop.f32.mrb[6].mxu0 }
 0x1b5   : > { %v1027_v48 = vpop.f32.mrb[7].mxu0 }
 0x1b8   : > { %v2624_v55 = vpop.f32.mrb[8].mxu0 }
 0x1b9   : > { %v1047_v60 = vpop.f32.mrb[9].mxu0 }
 0x1bc   : > { %v2635_v62 = vpop.f32.mrb[2].mxu0 }
 0x1bd   : > { %v1148_v8 = vpop.f32.mrb[3].mxu0 }
 0x1be   : > { %v2715_v13 = vpop.f32.mrb[4].mxu1 }
 0x1bf   : > { %v2814_v19 = vadd.f32 %v2715_v13, %v2635_v62  ;;  %v1652_v28 = vpop.f32.mrb[5].mxu1 }
 0x1c0   : > { %v2638_v16 = vpop.f32.mrb[4].mxu0  ;;  %v2815_v24 = vadd.f32 %v1652_v28, %v1148_v8 }
 0x1c1   : > { %v1160_v26 = vpop.f32.mrb[5].mxu0  ;;  %v1789_v21 = vadd.f32 %v2814_v19, %v1755_v23 }
 0x1c2   : > { %v1788_v27 = vadd.f32 %v2815_v24, %v1751_v25  ;;  %v2718_v29 = vpop.f32.mrb[6].mxu1 }
 0x1c3   : > { %2945 = vtanh.f32 %v1789_v21  ;;  %v2816_v30 = vadd.f32 %v2718_v29, %v2638_v16  ;;  %v1664_v1 = vpop.f32.mrb[7].mxu1  ;;  %v1852_v29 = vand.u32 127, %v1703_v43 }
 0x1c4   : > { %2947 = vtanh.f32 %v1788_v27  ;;  %v2817_v32 = vadd.f32 %v1664_v1, %v1160_v26 }
 0x1c5   : > { %v1791_v35 = vadd.f32 %v2816_v30, %v1763_v15  ;;  %v3780_v15 = vsub.s32 %v1852_v29, %v3750_v45 }
 0x1c6   : > { %v1790_v37 = vadd.f32 %v2817_v32, %v1759_v0  ;;  %v2721_v22 = vpop.f32.mrb[0].mxu1 }
 0x1c7   : > { %2949 = vtanh.f32 %v1791_v35  ;;  %v2818_v38 = vadd.f32 %v2721_v22, %v2621_v42  ;;  %v1676_v49 = vpop.f32.mrb[1].mxu1 }
 0x1c8   : > { %2951 = vtanh.f32 %v1790_v37  ;;  %v2819_v53 = vadd.f32 %v1676_v49, %v1027_v48 }
 0x1c9   : > { %v1793_v6 = vadd.f32 %v2818_v38, %v1771_v40 }
 0x1ca   : > { %v1792_v59 = vadd.f32 %v2819_v53, %v1767_v56  ;;  %v2724_v7 = vpop.f32.mrb[2].mxu1 }
 0x1cb   : > { %2953 = vtanh.f32 %v1793_v6  ;;  %v2820_v9 = vadd.f32 %v2724_v7, %v2624_v55  ;;  %v1688_v34 = vpop.f32.mrb[3].mxu1 }
 0x1cc   : > { %2955 = vtanh.f32 %v1792_v59  ;;  %v2821_v46 = vadd.f32 %v1688_v34, %v1047_v60 }
 0x1cd   : > { %v2946_v39 = vpop.eup %2945  ;;  %v1795_v47 = vadd.f32 %v2820_v9, %v1779_v11 }
 0x1ce   : > { %v2948_v42 = vpop.eup %2947  ;;  %v1794_v48 = vadd.f32 %v2821_v46, %v1775_v58  ;;  %v1812_v51 = vmul.f32 %v2946_v39, %v2431_v44  ;;  %v3185_v46 = vmov 0   ;;  %v1911_v58 = vsub.s32 1, %v3750_v45 }
 0x1cf   : > { %2957 = vtanh.f32 %v1795_v47  ;;  %v1811_v55 = vmul.f32 %v2948_v42, %v2431_v44  ;;  %2944 = vset.pattern.permute.xlu0 %v3185_v46  ;;  %2943 = vset.pattern.permute.xlu1 %v3185_v46  ;;  %v1915_v39 = vsub.s32 2, %v3750_v45  ;;  %v1919_v47 = vsub.s32 3, %v3750_v45 }
 0x1d0   : > { %2959 = vtanh.f32 %v1794_v48  ;;  %v1822_v54 = vsel %vm395_vm1, %v1812_v51, 0.0 }
 0x1d1   : > { %v2950_v61 = vpop.eup %2949  ;;  %1823 = vadd.xlane.f32.xlu0 %v1822_v54  ;;  %v1819_v4 = vsel %vm395_vm1, %v1811_v55, 0.0  ;;  %v1923_v55 = vsub.s32 4, %v3750_v45 }
 0x1d2   : > { %v2952_v62 = vpop.eup %2951  ;;  %v1814_v2 = vmul.f32 %v2950_v61, %v2431_v44 }
 0x1d3   : > { %v1813_v8 = vmul.f32 %v2952_v62, %v2431_v44 }
 0x1d4   : > { %v1828_v60 = vsel %vm395_vm1, %v1814_v2, 0.0 }
 0x1d5   : > { %v2954_v13 = vpop.eup %2953  ;;  %1820 = vadd.xlane.f32.xlu0 %v1819_v4  ;;  %1829 = vadd.xlane.f32.xlu1 %v1828_v60  ;;  %v1825_v23 = vsel %vm395_vm1, %v1813_v8, 0.0 }
 0x1d6   : > { %v2956_v14 = vpop.eup %2955  ;;  %v1816_v28 = vmul.f32 %v2954_v13, %v2431_v44  ;;  %v1927_v13 = vsub.s32 5, %v3750_v45 }
 0x1d7   : > { %v1815_v19 = vmul.f32 %v2956_v14, %v2431_v44 }
 0x1d8   : > { %v1834_v26 = vsel %vm395_vm1, %v1816_v28, 0.0  ;;  %v1931_v28 = vsub.s32 6, %v3750_v45 }
 0x1d9   : > { %v2958_v16 = vpop.eup %2957  ;;  %1826 = vadd.xlane.f32.xlu1 %v1825_v23  ;;  %v1831_v17 = vsel %vm395_vm1, %v1815_v19, 0.0 }
 0x1da   : > { %v2960_v24 = vpop.eup %2959  ;;  %1832 = vadd.xlane.f32.xlu0 %v1831_v17  ;;  %v1818_v18 = vmul.f32 %v2958_v16, %v2431_v44 }
 0x1db   : > { %v1817_v25 = vmul.f32 %v2960_v24, %v2431_v44 }
 0x1dc   : > { %v1840_v27 = vsel %vm395_vm1, %v1818_v18, 0.0 }
 0x1dd   : > { %1835 = vadd.xlane.f32.xlu1 %v1834_v26  ;;  %v1837_v21 = vsel %vm395_vm1, %v1817_v25, 0.0  ;;  %v1935_v25 = vsub.s32 7, %v3750_v45 }
 0x1de   : > { %1838 = vadd.xlane.f32.xlu0 %v1837_v21 }
 0x1e1   : > { %1841 = vadd.xlane.f32.xlu1 %v1840_v27 }
 0x25e   : > { %v1824_v30 = vpop.xlane.xlu0 %1823 }
 0x25f   : > { %v1860_v0 = vrot.slane %v1824_v30, %v3780_v15 }
 0x262   : > { %v1821_v1 = vpop.xlane.xlu0 %1820  ;;  %v1830_v31 = vpop.xlane.xlu1 %1829 }
 0x263   : > { %v1856_v32 = vrot.slane %v1821_v1, %v3780_v15  ;;  %v1868_v43 = vrot.slane %v1830_v31, %v3780_v15 }
 0x265   : > { %v1886_v22 = vsel %vm1885_vm2, %v1860_v0, %v1856_v32 }
 0x266   : > { %v1827_v20 = vpop.xlane.xlu1 %1826 }
 0x267   : > { %v1864_v35 = vrot.slane %v1827_v20, %v3780_v15  ;;  %v1833_v37 = vpop.xlane.xlu0 %1832 }
 0x268   : > { %v1872_v38 = vrot.slane %v1833_v37, %v3780_v15 }
 0x269   : > { %v1888_v40 = vsel %vm1887_vm3, %v1864_v35, %v1886_v22 }
 0x26a   : > { %v1890_v49 = vsel %vm1889_vm4, %v1868_v43, %v1888_v40  ;;  %v1836_v52 = vpop.xlane.xlu1 %1835 }
 0x26b   : > { %v1892_v53 = vsel %vm1891_vm5, %v1872_v38, %v1890_v49  ;;  %v1876_v56 = vrot.slane %v1836_v52, %v3780_v15  ;;  %v1839_v57 = vpop.xlane.xlu0 %1838 }
 0x26c   : > { %v1880_v6 = vrot.slane %v1839_v57, %v3780_v15 }
 0x26d   : > { %v1894_v59 = vsel %vm1893_vm6, %v1876_v56, %v1892_v53 }
 0x26e   : > { %v1842_v7 = vpop.xlane.xlu1 %1841  ;;  %v1896_v11 = vsel %vm1895_vm7, %v1880_v6, %v1894_v59 }
 0x26f   : > { %v1884_v9 = vrot.slane %v1842_v7, %v3780_v15 }
 0x271   : > { %v1898_v34 = vsel %vm1897_vm8, %v1884_v9, %v1896_v11 }
 0x272   : > { %v1901_v44 = vsel %vm1900_vm9, %v1898_v34, -inf }
 0x273   : > { %1902 = vmax.xlane.f32.xlu0 %v1901_v44 }
 0x300   : > { %v1903_v42 = vpop.xlane.xlu0 %1902 }
 0x301   : > { %v1908_v48 = vrot.slane %v1903_v42, %v3757_v10  ;;  %v1912_v51 = vrot.slane %v1903_v42, %v1911_v58  ;;  %v1916_v54 = vrot.slane %v1903_v42, %v1915_v39  ;;  %v1920_v61 = vrot.slane %v1903_v42, %v1919_v47 }
 0x302   : > { %v1924_v14 = vrot.slane %v1903_v42, %v1923_v55  ;;  %v1928_v16 = vrot.slane %v1903_v42, %v1927_v13  ;;  %v1932_v26 = vrot.slane %v1903_v42, %v1931_v28 }
 0x303   : > { %v1945_v62 = vsub.f32 %v1821_v1, %v1908_v48  ;;  %v1946_v2 = vsub.f32 %v1824_v30, %v1912_v51  ;;  %v1947_v4 = vsub.f32 %v1827_v20, %v1916_v54  ;;  %v1948_v19 = vsub.f32 %v1830_v31, %v1920_v61 }
 0x304   : > { %v1949_v17 = vsub.f32 %v1833_v37, %v1924_v14  ;;  %v1950_v18 = vsub.f32 %v1836_v52, %v1928_v16  ;;  %v1936_v30 = vrot.slane %v1903_v42, %v1935_v25  ;;  %v1951_v1 = vsub.f32 %v1839_v57, %v1932_v26 }
 0x305   : > { %v1953_v60 = vmul.f32 1.442695, %v1945_v62  ;;  %v1955_v8 = vmul.f32 1.442695, %v1946_v2  ;;  %v1957_v23 = vmul.f32 1.442695, %v1947_v4 }
 0x306   : > { %v1959_v24 = vmul.f32 1.442695, %v1948_v19  ;;  %v1961_v21 = vmul.f32 1.442695, %v1949_v17  ;;  %v1963_v31 = vmul.f32 1.442695, %v1950_v18  ;;  %v1952_v0 = vsub.f32 %v1842_v7, %v1936_v30 }
 0x307   : > { %2961 = vpow2.f32 %v1953_v60  ;;  %v1965_v20 = vmul.f32 1.442695, %v1951_v1 }
 0x308   : > { %2963 = vpow2.f32 %v1955_v8  ;;  %v1967_v37 = vmul.f32 1.442695, %v1952_v0 }
 0x309   : > { %2965 = vpow2.f32 %v1957_v23 }
 0x30a   : > { %2967 = vpow2.f32 %v1959_v24 }
 0x30b   : > { %2969 = vpow2.f32 %v1961_v21 }
 0x30c   : > { %2971 = vpow2.f32 %v1963_v31 }
 0x30d   : > { %2973 = vpow2.f32 %v1965_v20 }
 0x30e   : > { %2975 = vpow2.f32 %v1967_v37 }
 0x311   : > { %v2962_v27 = vpop.eup %2961 }
 0x312   : > { %v2964_v29 = vpop.eup %2963  ;;  %1978 = vperm.xlu1 %2943, %v2962_v27  }
 0x313   : > { %1981 = vperm.xlu0 %2944, %v2964_v29   ;;  %v2966_v32 = vpop.eup %2965 }
 0x314   : > { %v2968_v35 = vpop.eup %2967 }
 0x315   : > { %v2970_v22 = vpop.eup %2969 }
 0x316   : > { %1984 = vperm.xlu1 %2943, %v2966_v32   ;;  %v2972_v43 = vpop.eup %2971 }
 0x317   : > { %v2974_v38 = vpop.eup %2973 }
 0x318   : > { %v2976_v40 = vpop.eup %2975 }
 0x31a   : > { %1987 = vperm.xlu1 %2943, %v2968_v35  }
 0x31e   : > { %1990 = vperm.xlu1 %2943, %v2970_v22  }
 0x322   : > { %1993 = vperm.xlu1 %2943, %v2972_v43  }
 0x326   : > { %1996 = vperm.xlu1 %2943, %v2974_v38  }
 0x32a   : > { %1999 = vperm.xlu1 %2943, %v2976_v40  }
 0x391   : > { %v1979_v49 = vpop.permute.xlu1 %1978 }
 0x392   : > { %v1982_v57 = vpop.permute.xlu0 %1981  ;;  %v2004_v7 = vrot.slane %v1979_v49, %v3780_v15 }
 0x393   : > { %v2008_v59 = vrot.slane %v1982_v57, %v3780_v15 }
 0x395   : > { %v1985_v52 = vpop.permute.xlu1 %1984  ;;  %v2033_v46 = vsel %vm1885_vm2, %v2008_v59, %v2004_v7 }
 0x396   : > { %v2012_v9 = vrot.slane %v1985_v52, %v3780_v15 }
 0x398   : > { %v2034_v48 = vsel %vm1887_vm3, %v2012_v9, %v2033_v46 }
 0x399   : > { %v1988_v53 = vpop.permute.xlu1 %1987 }
 0x39a   : > { %v2016_v11 = vrot.slane %v1988_v53, %v3780_v15 }
 0x39c   : > { %v2035_v54 = vsel %vm1889_vm4, %v2016_v11, %v2034_v48 }
 0x39d   : > { %v1991_v56 = vpop.permute.xlu1 %1990 }
 0x39e   : > { %v2020_v34 = vrot.slane %v1991_v56, %v3780_v15 }
 0x3a0   : > { %v2036_v61 = vsel %vm1891_vm5, %v2020_v34, %v2035_v54 }
 0x3a1   : > { %v1994_v6 = vpop.permute.xlu1 %1993 }
 0x3a2   : > { %v2024_v42 = vrot.slane %v1994_v6, %v3780_v15 }
 0x3a4   : > { %v2037_v2 = vsel %vm1893_vm6, %v2024_v42, %v2036_v61 }
 0x3a5   : > { %v1997_v44 = vpop.permute.xlu1 %1996 }
 0x3a6   : > { %v2028_v51 = vrot.slane %v1997_v44, %v3780_v15 }
 0x3a8   : > { %v2038_v60 = vsel %vm1895_vm7, %v2028_v51, %v2037_v2 }
 0x3a9   : > { %v2000_v62 = vpop.permute.xlu1 %1999 }
 0x3aa   : > { %v2032_v4 = vrot.slane %v2000_v62, %v3780_v15 }
 0x3ac   : > { %v2039_v8 = vsel %vm1897_vm8, %v2032_v4, %v2038_v60 }
 0x3ad   : > { %v2041_v14 = vsel %vm1900_vm9, %v2039_v8, 0.0 }
 0x3ae   : > { %2042 = vadd.xlane.f32.xlu1 %v2041_v14 }
 0x43b   : > { %v2043_v19 = vpop.xlane.xlu1 %2042 }
 0x43c   : > { %2977 = vrcp.f32 %v2043_v19 }
 0x446   : > { %v2978_v23 = vpop.eup %2977 }
 0x447   : > { %v2049_v16 = vrot.slane %v2978_v23, %v3757_v10  ;;  %v2053_v24 = vrot.slane %v2978_v23, %v1911_v58  ;;  %v2057_v18 = vrot.slane %v2978_v23, %v1915_v39  ;;  %v2061_v30 = vrot.slane %v2978_v23, %v1919_v47 }
 0x448   : > { %v2065_v31 = vrot.slane %v2978_v23, %v1923_v55  ;;  %v2069_v58 = vrot.slane %v2978_v23, %v1927_v13  ;;  %v2073_v39 = vrot.slane %v2978_v23, %v1931_v28  ;;  %v2077_v47 = vrot.slane %v2978_v23, %v1935_v25 }
 0x449   : > { %v2086_v17 = vmul.f32 %v2962_v27, %v2049_v16  ;;  %v2087_v26 = vmul.f32 %v2964_v29, %v2053_v24  ;;  %v2088_v21 = vmul.f32 %v2966_v32, %v2057_v18  ;;  %v2089_v1 = vmul.f32 %v2968_v35, %v2061_v30 }
 0x44a   : > { %v2090_v10 = vmul.f32 %v2970_v22, %v2065_v31  ;;  %v2091_v27 = vmul.f32 %v2972_v43, %v2069_v58  ;;  %v2092_v29 = vmul.f32 %v2974_v38, %v2073_v39  ;;  %v2093_v32 = vmul.f32 %v2976_v40, %v2077_v47 }
 0x44b   : > { %2096 = vperm.xlu0 %2944, %v2086_v17  }
 0x44f   : > { %2101 = vperm.xlu0 %2944, %v2087_v26  }
 0x453   : > { %2106 = vperm.xlu0 %2944, %v2088_v21  }
 0x457   : > { %2111 = vperm.xlu0 %2944, %v2089_v1  }
 0x45b   : > { %2116 = vperm.xlu0 %2944, %v2090_v10  }
 0x45f   : > { %2121 = vperm.xlu0 %2944, %v2091_v27  }
 0x463   : > { %2126 = vperm.xlu0 %2944, %v2092_v29  }
 0x467   : > { %2131 = vperm.xlu0 %2944, %v2093_v32  }
 0x4ca   : > { %v2097_v0 = vpop.permute.xlu0 %2096 }
 0x4cb   : > { %v2134_v35 = vmul.f32 %v2097_v0, %v3593_v5  ;;  %v2218_v34 = vrot.slane %v2097_v0, %v3780_v15 }
 0x4cd   : > { %v2142_v22 = vsel %vm395_vm1, %v2134_v35, 0.0 }
 0x4ce   : > { %v2102_v55 = vpop.permute.xlu0 %2101  ;;  %v2143_v40 = vrot.slane %v2142_v22, 4 }
 0x4cf   : > { %v2135_v20 = vmul.f32 %v2102_v55, %v3609_v33 }
 0x4d0   : > { %v2144_v56 = vadd.f32 %v2143_v40, %v2142_v22 }
 0x4d1   : > { %v2149_v28 = vsel %vm395_vm1, %v2135_v20, 0.0 }
 0x4d2   : > { %v2107_v13 = vpop.permute.xlu0 %2106  ;;  %v2150_v38 = vrot.slane %v2149_v28, 4 }
 0x4d3   : > { %v2136_v37 = vmul.f32 %v2107_v13, %v3615_v36  ;;  %v2226_v46 = vrot.slane %v2107_v13, %v3780_v15 }
 0x4d4   : > { %v2151_v36 = vadd.f32 %v2150_v38, %v2149_v28 }
 0x4d5   : > { %v2156_v45 = vsel %vm395_vm1, %v2136_v37, 0.0 }
 0x4d6   : > { %v2112_v25 = vpop.permute.xlu0 %2111  ;;  %v2157_v49 = vrot.slane %v2156_v45, 4  ;;  %v2152_v44 = vrot.slane %v2151_v36, 2 }
 0x4d7   : > { %v2137_v43 = vmul.f32 %v2112_v25, %v3637_v50  ;;  %v2222_v50 = vrot.slane %v2102_v55, %v3780_v15  ;;  %v2230_v51 = vrot.slane %v2112_v25, %v3780_v15 }
 0x4d8   : > { %v2158_v57 = vadd.f32 %v2157_v49, %v2156_v45  ;;  %v2153_v19 = vadd.f32 %v2152_v44, %v2151_v36 }
 0x4d9   : > { %v2163_v33 = vsel %vm395_vm1, %v2137_v43, 0.0  ;;  %v2247_v4 = vsel %vm1885_vm2, %v2222_v50, %v2218_v34 }
 0x4da   : > { %v2164_v52 = vrot.slane %v2163_v33, 4  ;;  %v2117_v5 = vpop.permute.xlu0 %2116  ;;  %v2159_v48 = vrot.slane %v2158_v57, 2  ;;  %v2248_v23 = vsel %vm1887_vm3, %v2226_v46, %v2247_v4  ;;  %v2154_v47 = vrot.slane %v2153_v19, 1 }
 0x4db   : > { %v2138_v53 = vmul.f32 %v2117_v5, %v3540_v41  ;;  %v2145_v41 = vrot.slane %v2144_v56, 2  ;;  %v2234_v62 = vrot.slane %v2117_v5, %v3780_v15  ;;  %v2249_v18 = vsel %vm1889_vm4, %v2230_v51, %v2248_v23 }
 0x4dc   : > { %v2165_v59 = vadd.f32 %v2164_v52, %v2163_v33  ;;  %v2160_v26 = vadd.f32 %v2159_v48, %v2158_v57 }
 0x4dd   : > { %v2170_v6 = vsel %vm395_vm1, %v2138_v53, 0.0  ;;  %v2146_v24 = vadd.f32 %v2145_v41, %v2144_v56  ;;  %v2250_v1 = vsel %vm1891_vm5, %v2234_v62, %v2249_v18 }
 0x4de   : > { %v2171_v7 = vrot.slane %v2170_v6, 4  ;;  %v2122_v9 = vpop.permute.xlu0 %2121  ;;  %v2166_v61 = vrot.slane %v2165_v59, 2  ;;  %v2161_v20 = vrot.slane %v2160_v26, 1 }
 0x4df   : > { %v2139_v11 = vmul.f32 %v2122_v9, %v3583_v63  ;;  %v2238_v8 = vrot.slane %v2122_v9, %v3780_v15  ;;  %v2147_v37 = vrot.slane %v2146_v24, 1 }
 0x4e0   : > { %v2172_v42 = vadd.f32 %v2171_v7, %v2170_v6  ;;  %v2167_v30 = vadd.f32 %v2166_v61, %v2165_v59  ;;  %v2162_v40 = vadd.f32 %v2161_v20, %v2160_v26 }
 0x4e1   : > { %v2177_v54 = vsel %vm395_vm1, %v2139_v11, 0.0  ;;  %v2251_v27 = vsel %vm1893_vm6, %v2238_v8, %v2250_v1  ;;  %v2148_v49 = vadd.f32 %v2147_v37, %v2146_v24 }
 0x4e2   : > { %v2178_v2 = vrot.slane %v2177_v54, 4  ;;  %v2127_v63 = vpop.permute.xlu0 %2126  ;;  %v2173_v60 = vrot.slane %v2172_v42, 2  ;;  %v2168_v28 = vrot.slane %v2167_v30, 1 }
 0x4e3   : > { %v2140_v14 = vmul.f32 %v2127_v63, %v3588_v3  ;;  %v2242_v17 = vrot.slane %v2127_v63, %v3780_v15 }
 0x4e4   : > { %v2179_v16 = vadd.f32 %v2178_v2, %v2177_v54  ;;  %v2174_v3 = vadd.f32 %v2173_v60, %v2172_v42  ;;  %v2169_v33 = vadd.f32 %v2168_v28, %v2167_v30 }
 0x4e5   : > { %v2184_v21 = vsel %vm395_vm1, %v2140_v14, 0.0  ;;  %v2252_v55 = vsel %vm1895_vm7, %v2242_v17, %v2251_v27 }
 0x4e6   : > { %v2180_v31 = vrot.slane %v2179_v16, 2  ;;  %v2185_v10 = vrot.slane %v2184_v21, 4  ;;  %v2132_v58 = vpop.permute.xlu0 %2131  ;;  %v2175_v25 = vrot.slane %v2174_v3, 1 }
 0x4e7   : > { %v2141_v39 = vmul.f32 %v2132_v58, %v3606_v12  ;;  %v2246_v29 = vrot.slane %v2132_v58, %v3780_v15  ;;  %v2155_v12 = vadd.f32 %v2154_v47, %v2153_v19 }
 0x4e8   : > { %v2181_v32 = vadd.f32 %v2180_v31, %v2179_v16  ;;  %v2186_v0 = vadd.f32 %v2185_v10, %v2184_v21  ;;  %v2176_v53 = vadd.f32 %v2175_v25, %v2174_v3 }
 0x4e9   : > { %v2191_v35 = vsel %vm395_vm1, %v2141_v39, 0.0  ;;  %v2253_v13 = vsel %vm1897_vm8, %v2246_v29, %v2252_v55  ;;  %v2206_v36 = vsel %vm1885_vm2, %v2155_v12, %v2148_v49 }
 0x4ea   : > { %v2187_v22 = vrot.slane %v2186_v0, 2  ;;  %v2192_v45 = vrot.slane %v2191_v35, 4  ;;  %2255 = vst.msk [vmem:[%s374_s2] sm:$0xff] %vm1900_vm9, %v2253_v13  ;;  %v2182_v43 = vrot.slane %v2181_v32, 1  ;;  %v2207_v6 = vsel %vm1887_vm3, %v2162_v40, %v2206_v36 }
 0x4eb   : > { %v2208_v7 = vsel %vm1889_vm4, %v2169_v33, %v2207_v6 }
 0x4ec   : > { %v2188_v15 = vadd.f32 %v2187_v22, %v2186_v0  ;;  %v2193_v38 = vadd.f32 %v2192_v45, %v2191_v35  ;;  %v2183_v56 = vadd.f32 %v2182_v43, %v2181_v32  ;;  %v2209_v50 = vsel %vm1891_vm5, %v2176_v53, %v2208_v7 }
 0x4ee   : > { %v2189_v52 = vrot.slane %v2188_v15, 1  ;;  %v2194_v5 = vrot.slane %v2193_v38, 2  ;;  %v2210_v11 = vsel %vm1893_vm6, %v2183_v56, %v2209_v50 }
 0x4f0   : > { %v2195_v57 = vadd.f32 %v2194_v5, %v2193_v38  ;;  %v2190_v59 = vadd.f32 %v2189_v52, %v2188_v15 }
 0x4f2   : > { %v2196_v9 = vrot.slane %v2195_v57, 1  ;;  %v2211_v44 = vsel %vm1895_vm7, %v2190_v59, %v2210_v11 }
 0x4f4   : > { %v2197_v34 = vadd.f32 %v2196_v9, %v2195_v57 }
 0x4f6   : > { %v2212_v46 = vsel %vm1897_vm8, %v2197_v34, %v2211_v44 }
 0x4f7   : > { %2214 = vst.msk [vmem:[%s363_s13] sm:$0xff] %vm395_vm1, %v2212_v46 }
 0x4f8   : > { %3108 = shalt.err (!%p3105_p9)
}
 0x4f9   : > { %s3109_s29 = scalar_lea.hbm %s3903_s19, 128  ;;  %s3113_s14 = scalar_lea.hbm %s3955_s6, 256 }
 0x4fa   : > { %p3110_p0 = scmp.ne.s32.totalorder %s3903_s19, %s3109_s29  ;;  %p3114_p2 = scmp.lt.u32.totalorder %s3903_s19, %s3955_s6 }
 0x4fb   : > { %p3115_p12 = scmp.lt.u32.totalorder %s3113_s14, %s3109_s29  ;;  %p3117_p13 = scmp.lt.u32.totalorder %s3109_s29, %s3903_s19 }
 0x4fc   : > { %p3111_p8 = pnand %p3110_p0, %p3983_p6 }
 0x4fd   : > { %p3116_p1 = por %p3115_p12, %p3114_p2 }
 0x4fe   : > { %p3112_p11 = pneg %p3111_p8 }
 0x4ff   : > { %p3118_p10 = por %p3117_p13, %p3116_p1 }
 0x501   : > { %p3119_p4 = pnand %p3118_p10, %p3112_p11 }
 0x503   : > { %3122 = shalt.err (!%p3119_p4)
}
 0x504   : > { %2876 = dma.vmem_to_hbm [thread:$0]  (%p3983_p6), %s3905_s0, 128, %s3903_s19, %s2257_s28  }
 0x505 PF: > { %s2289_s2 = sand.u32 1, %s3161_s24   ;;  %p3984_p5 = scmp.ne.s32.totalorder %s3966_s8, 0 }
 0x506   : > { %p3985_p3 = scmp.ge.s32.totalorder %s3173_s27, 2  ;;  %s2290_s11 = scalar_lea.sflag [#allocation4], %s2289_s2 }
 0x508   : > { %p2893_p7 = pnand %p3985_p3, %p3984_p5 }
 0x50a   : > { %3156 = dma.done.wait (!%p2893_p7), %s2290_s11, 128  }
 0x50b   : > { %3158 = vsyncadd (!%p2893_p7), %s2290_s11, 4294967168  ;;  %p25_p9 = scmp.ge.s32.totalorder %s3343_s12, 4   ;;  %s3986_s24 = smov %s3165_s25 }
 0x50c   : > { %s3987_s25 = smov %s3169_s26  ;;  %s3988_s26 = smov %s3359_s17 }
 0x50d   : > { %s3989_s27 = smov %s3343_s12  ;;  %27 = sbr.rel (!%p25_p9) target bundleno = 12 (0xc), region = 122 }
 0x514   :  { %2302 = vsyncpa [#allocation3], 1 }
 0x515   :  { %2304 = vsyncpa [#allocation3 + $0x1], 1 }
 0x516   :  { %2305 = vsyncpa [#allocation6], 1 }
 0x517   :  { %2307 = vsyncpa [#allocation6 + $0x1], 1 }
 0x518   :  { %2308 = vsyncpa [#allocation9], 1 }
 0x519   :  { %2309 = vsyncpa [#allocation4], 1 }
 0x51a   :  { %2311 = vsyncpa [#allocation4 + $0x1], 1 }

// kernel: tpu_custom_call.1
= control target key start
LH: loop header
LB: loop body
LE: loop exit
PB: predicated region body
PF: predicated region fallthrough
CT: control target
= control target key end

     0   :  { %s3949_s0 = inlined_call_operand.hbm [shape: f32[16,32], index: 0, kind: input, shape index: {}]   ;;  %s3950_s1 = inlined_call_operand.hbm [shape: f32[16,8,32], index: 1, kind: input, shape index: {}]   ;;  %s3951_s2 = inlined_call_operand.hbm [shape: f32[32,32], index: 2, kind: input, shape index: {}]   ;;  %s3952_s3 = inlined_call_operand.hbm [shape: f32[32,32], index: 3, kind: input, shape index: {}]   ;;  %s3953_s4 = inlined_call_operand.vmem [shape: f32[1,32], index: 4, kind: input, shape index: {}]   ;;  %s3954_s5 = inlined_call_operand.vmem [shape: f32[1,32], index: 5, kind: input, shape index: {}]   ;;  %s3955_s6 = inlined_call_operand.hbm [shape: f32[16,32], index: 6, kind: output, shape index: {0}]   ;;  %s3956_s7 = inlined_call_operand.vmem [shape: f32[16,8], index: 7, kind: output, shape index: {1}]  }
   0x1   :  { %3962 = sst [smem:[#allocation16_spill]] %s3949_s0 }
   0x2   :  { %3963 = sst [smem:[#allocation17_spill]] %s3951_s2 }
   0x3   :  { %3964 = sst [smem:[#allocation18_spill]] %s3952_s3 }
   0x4   :  { %13 = vsyncpa [#allocation3], 0 }
   0x5   :  { %15 = vsyncpa [#allocation3 + $0x1], 0 }
   0x6   :  { %16 = vsyncpa [#allocation6], 0 }
   0x7   :  { %18 = vsyncpa [#allocation6 + $0x1], 0 }
   0x8   :  { %19 = vsyncpa [#allocation9], 0 }
   0x9   :  { %20 = vsyncpa [#allocation4], 0 }
   0xa   :  { %22 = vsyncpa [#allocation4 + $0x1], 0  ;;  %s3227_s24 = smov 0   ;;  %s3229_s25 = smov 0  }
   0xb   :  { %s3231_s26 = smov 0   ;;  %s3233_s27 = smov 0  }
   0xc LB: > { %s3248_s28 = sadd.s32 4294967295, %s3173_s27   ;;  %s2413_s29 = sadd.s32 4294967294, %s3173_s27   ;;  %s3173_s27 = sphi %s3233_s27, %s3989_s27   ;;  %s3169_s26 = sphi %s3231_s26, %s3988_s26   ;;  %s3165_s25 = sphi %s3229_s25, %s3987_s25   ;;  %s3161_s24 = sphi %s3227_s24, %s3986_s24  }
   0xd   : > { %p48_p0 = scmp.ne.s32.totalorder %s3165_s25, %s3161_s24  ;;  %p3957_p1 = scmp.eq.s32.totalorder %s3248_s28, 0 }
   0xe   : > { %p188_p3 = scmp.eq.s32.totalorder %s2413_s29, 1  ;;  %p2414_p5 = scmp.ge.s32.totalorder %s3173_s27, 1 }
   0xf   : > { %p3257_p4 = por %p3957_p1, %p48_p0  ;;  %p221_p7 = scmp.lt.s32.totalorder %s3173_s27, 3 }
  0x10   : > { %p3262_p6 = por %p188_p3, %p48_p0  ;;  %s3175_s10 = smov [#allocation7]  }
  0x11   : > { %s3965_s30 = scalar_select %p3257_p4, 1, 0 }
  0x12   : > { %s3966_s8 = scalar_select %p3262_p6, 1, 0 }
  0x13   : > { %p3267_p8 = pnand %p2414_p5, %p221_p7  ;;  %s233_s11 = sshll.u32 %s3175_s10, 4  ;;  %s3271_s11 = int_to_ptr.vmem [resolvable:$true] %s233_s11 }
  0x14   : > { %s3176_s13 = smov [#allocation8]   ;;  %s3969_s2 = sld [smem:[#allocation17_spill]] }
  0x15   : > { %p2878_p9 = pneg %p3267_p8  ;;  %s246_s14 = sshll.u32 %s3176_s13, 4  ;;  %s3282_s14 = int_to_ptr.vmem [resolvable:$true] %s246_s14 }
  0x17   : > { %p3278_p11 = pnand %p2878_p9, %p3957_p1 }
  0x19   : > { %p2981_p13 = pneg %p3278_p11 }
  0x1a   : > { %s2979_s17 = scalar_lea.hbm %s3969_s2, 512 }
  0x1b   : > { %p2980_p12 = scmp.ne.s32.totalorder %s3969_s2, %s2979_s17  ;;  %p2986_p5 = scmp.lt.u32.totalorder %s2979_s17, %s3969_s2 }
  0x1d   : > { %p2982_p0 = pnand %p2981_p13, %p2980_p12 }
  0x1f   : > { %p2983_p3 = pneg %p2982_p0 }
  0x21   : > { %p2988_p7 = pnand %p2986_p5, %p2983_p3 }
  0x23   : > { %2991 = shalt.err (!%p2988_p7)
}
  0x24   : > { %s2992_s22 = scalar_lea.vmem %s3271_s11, 512  ;;  %p3000_p2 = scmp.lt.s32.totalorder %s3271_s11, %s3271_s11 }
  0x25   : > { %p2993_p9 = scmp.ne.s32.totalorder %s3271_s11, %s2992_s22  ;;  %p3001_p12 = scmp.lt.s32.totalorder %s2992_s22, %s2992_s22 }
  0x27   : > { %p2995_p10 = pnand %p2993_p9, %p2981_p13  ;;  %p3002_p0 = por %p3001_p12, %p3000_p2 }
  0x29   : > { %p2996_p1 = pneg %p2995_p10 }
  0x2b   : > { %p3003_p6 = pnand %p3002_p0, %p2996_p1 }
  0x2d   : > { %3006 = shalt.err (!%p3003_p6)
}
  0x2e   : > { %s3958_s23 = smov 128   ;;  %s3959_s29 = smov 8  }
  0x2f   : > { %2881 = dma.hbm_to_vmem [thread:$0]  (!%p3278_p11), %s3969_s2, 512, %s3271_s11, [#allocation6], %s3958_s23, %s3958_s23, %s3959_s29  }
  0x30   : > { %s3970_s3 = sld [smem:[#allocation18_spill]] }
  0x36   : > { %s3007_s17 = scalar_lea.hbm %s3970_s3, 512 }
  0x37   : > { %p3008_p1 = scmp.ne.s32.totalorder %s3970_s3, %s3007_s17  ;;  %p3014_p10 = scmp.lt.u32.totalorder %s3007_s17, %s3970_s3 }
  0x39   : > { %p3010_p2 = pnand %p3008_p1, %p2981_p13 }
  0x3b   : > { %p3011_p6 = pneg %p3010_p2 }
  0x3d   : > { %p3016_p3 = pnand %p3014_p10, %p3011_p6 }
  0x3f   : > { %3019 = shalt.err (!%p3016_p3)
}
  0x40   : > { %s3020_s11 = scalar_lea.vmem %s3282_s14, 512  ;;  %p3028_p12 = scmp.lt.s32.totalorder %s3282_s14, %s3282_s14 }
  0x41   : > { %p3021_p5 = scmp.ne.s32.totalorder %s3282_s14, %s3020_s11  ;;  %p3029_p0 = scmp.lt.s32.totalorder %s3020_s11, %s3020_s11 }
  0x43   : > { %p3023_p7 = pnand %p3021_p5, %p2981_p13  ;;  %p3030_p1 = por %p3029_p0, %p3028_p12 }
  0x45   : > { %p3024_p9 = pneg %p3023_p7 }
  0x47   : > { %p3031_p2 = pnand %p3030_p1, %p3024_p9 }
  0x49   : > { %3034 = shalt.err (!%p3031_p2)
}
  0x4a   : > { %2884 = dma.hbm_to_vmem [thread:$0]  (!%p3278_p11), %s3970_s3, 512, %s3282_s14, [#allocation9], %s3958_s23, %s3958_s23, %s3959_s29  }
  0x4b   : > { %s3343_s12 = sadd.s32 1, %s3173_s27   ;;  %s35_s13 = sadd.s32 1, %s3169_s26 }
  0x4c   : > { %s32_s15 = ssub.s32 %s3173_s27, %s3343_s12  ;;  %p42_p13 = scmp.ne.s32.totalorder %s3169_s26, %s3165_s25 }
  0x4d   : > { %p33_p6 = scmp.eq.s32.totalorder %s32_s15, 0  ;;  %p43_p10 = scmp.eq.s32.totalorder %s3173_s27, 0 }
  0x4e   : > { %p3971_p3 = scmp.eq.s32.totalorder %s3248_s28, 1  ;;  %p2898_p7 = scmp.lt.s32.totalorder %s3173_s27, 2 }
  0x4f   : > { %s3359_s17 = scalar_select %p33_p6, %s3169_s26, %s35_s13  }
  0x50   : > { %p3353_p5 = por %p3971_p3, %p42_p13  ;;  %p44_p9 = por %p43_p10, %p42_p13 }
  0x51   : > { %s3362_s18 = sand.u32 1, %s3169_s26   ;;  %s2419_s19 = sshll.u32 %s3173_s27, 7 }
  0x52   : > { %s3972_s16 = scalar_select %p3353_p5, 1, 0 }
  0x53   : > { %s2418_s14 = sshll.u32 %s3362_s18, 3  ;;  %s3973_s0 = sld [smem:[#allocation16_spill]] }
  0x54   : > { %s270_s22 = scalar_lea.vmem [#allocation2], %s2418_s14  ;;  %p3373_p11 = pnand %p2898_p7, %p44_p9 }
  0x55   : > { %s277_s10 = sshll.u32 %s270_s22, 4  ;;  %s2420_s15 = sshll.u32 %s3362_s18, 6  ;;  %s3371_s10 = int_to_ptr.vmem [resolvable:$true] %s277_s10 }
  0x56   : > { %s267_s29 = scalar_lea.sflag [#allocation3], %s3362_s18  ;;  %p3037_p0 = pneg %p3373_p11 }
  0x59   : > { %s3369_s11 = scalar_lea.hbm %s3973_s0, %s2419_s19  ;;  %s3040_s21 = scalar_lea.hbm %s3973_s0, 256 }
  0x5a   : > { %s3035_s20 = scalar_lea.hbm %s3369_s11, 128  ;;  %p3041_p13 = scmp.lt.u32.totalorder %s3369_s11, %s3973_s0 }
  0x5b   : > { %p3036_p12 = scmp.ne.s32.totalorder %s3369_s11, %s3035_s20  ;;  %p3042_p6 = scmp.lt.u32.totalorder %s3040_s21, %s3035_s20 }
  0x5c   : > { %p3044_p3 = scmp.lt.u32.totalorder %s3035_s20, %s3369_s11 }
  0x5d   : > { %p3038_p1 = pnand %p3037_p0, %p3036_p12  ;;  %p3043_p10 = por %p3042_p6, %p3041_p13 }
  0x5f   : > { %p3039_p2 = pneg %p3038_p1  ;;  %p3045_p7 = por %p3044_p3, %p3043_p10 }
  0x61   : > { %p3046_p9 = pnand %p3045_p7, %p3039_p2 }
  0x63   : > { %3049 = shalt.err (!%p3046_p9)
}
  0x64   : > { %s3050_s23 = scalar_lea.vmem %s3371_s10, 128  ;;  %s3179_s14 = smov [#allocation2]  }
  0x65   : > { %p3051_p12 = scmp.ne.s32.totalorder %s3371_s10, %s3050_s23  ;;  %s3055_s19 = sshll.u32 %s3179_s14, 4  ;;  %s3056_s19 = int_to_ptr.vmem [resolvable:$false] %s3055_s19 }
  0x66   : > { %s3057_s2 = scalar_lea.vmem %s3056_s19, 256  ;;  %p3058_p4 = scmp.lt.s32.totalorder %s3371_s10, %s3056_s19 }
  0x67   : > { %p3053_p1 = pnand %p3051_p12, %p3037_p0  ;;  %p3059_p13 = scmp.lt.s32.totalorder %s3057_s2, %s3050_s23 }
  0x69   : > { %p3054_p5 = pneg %p3053_p1  ;;  %p3060_p6 = por %p3059_p13, %p3058_p4 }
  0x6b   : > { %p3061_p10 = pnand %p3060_p6, %p3054_p5 }
  0x6d   : > { %3064 = shalt.err (!%p3061_p10)
}
  0x6e   : > { %2888 = dma.hbm_to_vmem [thread:$0]  (!%p3373_p11), %s3369_s11, 128, %s3371_s10, %s267_s29  }
  0x6f   : > { %s288_s20 = scalar_lea.vmem [#allocation5], %s2420_s15  ;;  %s2436_s22 = sshll.u32 %s3173_s27, 10 }
  0x70   : > { %s295_s21 = sshll.u32 %s288_s20, 4  ;;  %s3413_s19 = scalar_lea.hbm %s3950_s1, %s2436_s22  ;;  %s3407_s21 = int_to_ptr.vmem [resolvable:$true] %s295_s21 }
  0x71   : > { %s3975_s2 = sand.u32 1, %s3173_s27   ;;  %s3065_s3 = scalar_lea.hbm %s3413_s19, 1024 }
  0x72   : > { %s3417_s0 = scalar_lea.sflag [#allocation6], %s3975_s2  ;;  %p3066_p4 = scmp.ne.s32.totalorder %s3413_s19, %s3065_s3 }
  0x73   : > { %s3070_s11 = scalar_lea.hbm %s3950_s1, 2048  ;;  %p3071_p3 = scmp.lt.u32.totalorder %s3413_s19, %s3950_s1 }
  0x74   : > { %p3068_p5 = pnand %p3066_p4, %p3037_p0  ;;  %p3072_p7 = scmp.lt.u32.totalorder %s3070_s11, %s3065_s3 }
  0x75   : > { %p3074_p12 = scmp.lt.u32.totalorder %s3065_s3, %s3413_s19 }
  0x76   : > { %p3069_p2 = pneg %p3068_p5  ;;  %p3073_p9 = por %p3072_p7, %p3071_p3 }
  0x78   : > { %p3075_p1 = por %p3074_p12, %p3073_p9 }
  0x7a   : > { %p3076_p13 = pnand %p3075_p1, %p3069_p2 }
  0x7c   : > { %3079 = shalt.err (!%p3076_p13)
}
  0x7d   : > { %s3080_s20 = scalar_lea.vmem %s3407_s21, 1024  ;;  %s3180_s22 = smov [#allocation5]  }
  0x7e   : > { %p3081_p6 = scmp.ne.s32.totalorder %s3407_s21, %s3080_s20  ;;  %s3085_s14 = sshll.u32 %s3180_s22, 4  ;;  %s3086_s14 = int_to_ptr.vmem [resolvable:$false] %s3085_s14 }
  0x7f   : > { %s3087_s23 = scalar_lea.vmem %s3086_s14, 2048  ;;  %p3088_p5 = scmp.lt.s32.totalorder %s3407_s21, %s3086_s14 }
  0x80   : > { %p3083_p10 = pnand %p3081_p6, %p3037_p0  ;;  %p3089_p3 = scmp.lt.s32.totalorder %s3087_s23, %s3080_s20 }
  0x82   : > { %p3084_p4 = pneg %p3083_p10  ;;  %p3090_p7 = por %p3089_p3, %p3088_p5 }
  0x84   : > { %p3091_p9 = pnand %p3090_p7, %p3084_p4 }
  0x86   : > { %3094 = shalt.err (!%p3091_p9)
}
  0x87   : > { %s3976_s3 = smov 8   ;;  %s3977_s2 = smov 128  }
  0x88   : > { %2891 = dma.hbm_to_vmem [thread:$0]  (!%p3373_p11), %s3413_s19, 1024, %s3407_s21, %s3417_s0, %s3977_s2, %s3977_s2, %s3976_s3  }
  0x89   : > { %307 = sbr.rel (%p3267_p8) target bundleno = 1285 (0x505), region = 44  ;;  %s3449_s29 = sand.u32 (!%p3267_p8), 1, %s3165_s25  }
  0x8a   : > { %s2424_s18 = sshll.u32 (!%p3267_p8), %s3449_s29, 3  ;;  %s310_s11 = scalar_lea.sflag (!%p3267_p8), [#allocation3], %s3449_s29 }
  0x8b   : > { %s313_s13 = scalar_lea.vmem (!%p3267_p8), [#allocation2], %s2424_s18  ;;  %p3978_p0 = scmp.ne.s32.totalorder (!%p3267_p8), %s3965_s30, 0 }
  0x90   : > { %3140 = dma.done.wait (%p3978_p0), %s310_s11, 128  }
  0x91   : > { %3142 = vsyncadd (%p3978_p0), %s310_s11, 4294967168  ;;  %s318_s0 = sand.u32 1, %s3248_s28   ;;  %s2425_s9 = sshll.u32 %s3449_s29, 6 }
  0x92   : > { %s319_s21 = scalar_lea.sflag [#allocation6], %s318_s0  ;;  %s3461_s19 = scalar_lea.vmem [#allocation5], %s2425_s9 }
  0x93   : > { %3144 = dma.done.wait (%p3978_p0), %s319_s21, 1024  }
  0x94   : > { %3146 = vsyncadd (%p3978_p0), %s319_s21, 4294966272  ;;  %p3979_p8 = scmp.eq.s32.totalorder %s3248_s28, 0 }
  0x96   : > { %3148 = dma.done.wait (%p3979_p8), [#allocation6], 512   ;;  %p3980_p11 = pmov %p3979_p8 }
  0x97   : > { %p3981_p2 = pmov %p3979_p8 }
  0x98   : > { %3150 = vsyncadd (%p3980_p11), [#allocation6], 4294966784 }
  0x99   : > { %3152 = dma.done.wait (%p3981_p2), [#allocation9], 512   ;;  %p3982_p12 = pmov %p3981_p2 }
  0x9a   : > { %v3181_v0 = vmov 0.0|0.0   ;;  %vm3182_vm0 = vmmov 0   ;;  %v3183_v1 = vmov 0.0   ;;  %vm395_vm1 = vcmask 261120   ;;  %v384_v2 = vld [vmem:[#allocation7] sm:$0xff]  ;;  %v385_v3 = vld [vmem:[#allocation7 + $0x8] sm:$0xff] }
  0x9b   : > { %3154 = vsyncadd (%p3982_p12), [#allocation9], 4294966784  ;;  %2725 = vmatprep.subr.bf16.mxu0 %v3181_v0  ;;  %2547 = vmatprep.mubr.msk.f32.mxu0 %vm3182_vm0, %v3183_v1  ;;  %v386_v4 = vld [vmem:[#allocation7 + $0x10] sm:$0xff]  ;;  %v400_v5 = vand.u32 4294901760, %v384_v2  ;;  %v403_v6 = vand.u32 4294901760, %v385_v3  ;;  %v387_v7 = vld [vmem:[#allocation7 + $0x18] sm:$0xff] }
  0x9c   : > { %v406_v8 = vand.u32 4294901760, %v386_v4  ;;  %v375_v9 = vld [vmem:[%s313_s13] sm:$0xff]  ;;  %v3478_v10 = vld [vmem:[#allocation8] sm:$0xff]  ;;  %v409_v11 = vand.u32 4294901760, %v387_v7  ;;  %v3481_v13 = vld [vmem:[#allocation8 + $0x8] sm:$0xff]  ;;  %vm1885_vm2 = vcmask 1041409  }
  0x9d   : > { %v397_v12 = vsel %vm395_vm1, %v375_v9, 0  ;;  %v913_v14 = vand.u32 4294901760, %v3478_v10  ;;  %v3484_v15 = vpack.c.bf16 %v403_v6, %v400_v5  ;;  %v3486_v16 = vsub.f32 %v384_v2, %v400_v5  ;;  %v3492_v19 = vld [vmem:[#allocation8 + $0x10] sm:$0xff]  ;;  %v3510_v28 = vld [vmem:[#allocation8 + $0x18] sm:$0xff]  ;;  %v3540_v41 = vld [vmem:[%s3461_s19 + $0x20] sm:$0xff]  ;;  %p371_p1 = scmp.lt.s32.totalorder %s3248_s28, 1 }
  0x9e   : > { %v3488_v17 = vsub.f32 %v385_v3, %v403_v6  ;;  %v3490_v18 = vsub.f32 %v386_v4, %v406_v8  ;;  %v3494_v20 = vpack.c.bf16 %v409_v11, %v406_v8  ;;  %v3496_v21 = vsub.f32 %v387_v7, %v409_v11  ;;  %v3583_v63 = vld [vmem:[%s3461_s19 + $0x28] sm:$0xff]  ;;  %v3588_v3 = vld [vmem:[%s3461_s19 + $0x30] sm:$0xff]  ;;  %v3593_v5 = vld [vmem:[%s3461_s19] sm:$0xff]  ;;  %s2433_s11 = sshll.u32 %s3248_s28, 7  ;;  %s363_s13 = scalar_lea.vmem [#allocation10], %s2424_s18 }
  0x9f   : > { %v3498_v22 = vand.u32 4294901760, %v397_v12  ;;  %v916_v23 = vand.u32 4294901760, %v3481_v13  ;;  %2727 = vmatpush3.bf16.msra.mxu0 %v3484_v15  ;;  %v481_v24 = vand.u32 4294901760, %v3486_v16  ;;  %v3507_v26 = vsub.f32 %v3478_v10, %v913_v14  ;;  %s3867_s22 = scalar_select %p371_p1, %s3248_s28, 1 }
  0xa0   : > { %v488_v25 = vand.u32 4294901760, %v3488_v17  ;;  %v495_v27 = vand.u32 4294901760, %v3490_v18  ;;  %2728 = vmatprep.subr.bf16.mxu0 %v3181_v0  ;;  %v502_v31 = vand.u32 4294901760, %v3496_v21  ;;  %v919_v32 = vand.u32 4294901760, %v3492_v19  ;;  %s2274_s0 = sshll.u32 %s363_s13, 4  ;;  %s2257_s28 = scalar_lea.sflag [#allocation4], %s3449_s29  ;;  %s3905_s0 = int_to_ptr.vmem [resolvable:$true] %s2274_s0 }
  0xa1   : > { %v3514_v29 = vsub.f32 %v397_v12, %v3498_v22  ;;  %v3519_v30 = vsub.f32 %v3481_v13, %v916_v23  ;;  %v482_v33 = vsub.f32 %v3486_v16, %v481_v24  ;;  %v1064_v35 = vand.u32 4294901760, %v3507_v26  ;;  %v3606_v12 = vld [vmem:[%s3461_s19 + $0x38] sm:$0xff]  ;;  %s2429_s14 = sshll.u32 %s3867_s22, 3  ;;  %s3095_s18 = scalar_lea.vmem %s3905_s0, 128 }
  0xa2   : > { %v489_v34 = vsub.f32 %v3488_v17, %v488_v25  ;;  %v496_v36 = vsub.f32 %v3490_v18, %v495_v27  ;;  %v503_v39 = vsub.f32 %v3496_v21, %v502_v31  ;;  %v922_v40 = vand.u32 4294901760, %v3510_v28  ;;  %s374_s2 = scalar_lea.vmem %s3956_s7, %s2429_s14  ;;  %p3096_p13 = scmp.ne.s32.totalorder %s3905_s0, %s3095_s18 }
  0xa3   : > { %v470_v37 = vand.u32 4294901760, %v3514_v29  ;;  %v1071_v38 = vand.u32 4294901760, %v3519_v30  ;;  %2730 = vmatpush3.bf16.msra.mxu0 %v3494_v20  ;;  %v483_v42 = vand.u32 4294901760, %v482_v33  ;;  %v1065_v44 = vsub.f32 %v3507_v26, %v1064_v35  ;;  %v3609_v33 = vld [vmem:[%s3461_s19 + $0x8] sm:$0xff]  ;;  %p3983_p6 = scmp.ne.s32.totalorder %s3972_s16, 0  ;;  %s3186_s30 = smov [#allocation10]  }
  0xa4   : > { %v490_v43 = vand.u32 4294901760, %v489_v34  ;;  %v497_v45 = vand.u32 4294901760, %v496_v36  ;;  %2731 = vmatprep.subr.bf16.mxu0 %v3181_v0  ;;  %v504_v48 = vand.u32 4294901760, %v503_v39  ;;  %v3556_v49 = vsub.f32 %v3492_v19, %v919_v32  ;;  %v3615_v36 = vld [vmem:[%s3461_s19 + $0x10] sm:$0xff]  ;;  %s3099_s10 = sshll.u32 %s3186_s30, 4  ;;  %s3100_s10 = int_to_ptr.vmem [resolvable:$false] %s3099_s10 }
  0xa5   : > { %v471_v46 = vsub.f32 %v3514_v29, %v470_v37  ;;  %v1072_v47 = vsub.f32 %v3519_v30, %v1071_v38  ;;  %v1066_v51 = vand.u32 4294901760, %v1065_v44  ;;  %v3561_v52 = vsub.f32 %v3510_v28, %v922_v40  ;;  %p3097_p10 = pnand %p3096_p13, %p3983_p6  ;;  %s3101_s15 = scalar_lea.vmem %s3100_s10, 256 }
  0xa6   : > { %v2732_v50 = vpack.c.bf16 %v490_v43, %v483_v42  ;;  %v3565_v53 = vsel %vm395_vm1, %v3540_v41, 0  ;;  %v1078_v56 = vand.u32 4294901760, %v3556_v49  ;;  %v2735_v61 = vpack.c.bf16 %v504_v48, %v497_v45  ;;  %p3102_p5 = scmp.lt.s32.totalorder %s3905_s0, %s3100_s10  ;;  %p3103_p3 = scmp.lt.s32.totalorder %s3101_s15, %s3095_s18 }
  0xa7   : > { %v472_v54 = vand.u32 4294901760, %v471_v46  ;;  %v1073_v55 = vand.u32 4294901760, %v1072_v47  ;;  %v1085_v57 = vand.u32 4294901760, %v3561_v52  ;;  %v3570_v58 = vand.u32 4294901760, %v3565_v53  ;;  %p3098_p4 = pneg %p3097_p10 }
  0xa8   : > { %v1079_v60 = vsub.f32 %v3556_v49, %v1078_v56  ;;  %v904_v6 = vsel %vm395_vm1, %v3583_v63, 0  ;;  %v2738_v8 = vpack.c.bf16 %v3488_v17, %v3486_v16  ;;  %v2777_v9 = vpack.c.bf16 %v3519_v30, %v3507_v26  ;;  %p3104_p7 = por %p3103_p3, %p3102_p5 }
  0xa9   : > { %2548 = vmatmul.mubr.f32.vlgmr.msra.gmra.mrb[0].mxu0 %v472_v54  ;;  %v3572_v59 = vpack.c.bf16 %v1073_v55, %v1066_v51  ;;  %v1086_v62 = vsub.f32 %v3561_v52, %v1085_v57  ;;  %2639 = vmatprep.mubr.f32.mxu1 %v3570_v58  ;;  %v907_v11 = vsel %vm395_vm1, %v3588_v3, 0  ;;  %v889_v34 = vsel %vm395_vm1, %v3593_v5, 0 }
  0xaa   : > { %2733 = vmatpush3.bf16.msra.mxu0 %v2732_v50  ;;  %2558 = vmatprep.mubr.msk.f32.mxu0 %vm3182_vm0, %v3183_v1  ;;  %v1080_v2 = vand.u32 4294901760, %v1079_v60  ;;  %v3618_v39 = vand.u32 4294901760, %v904_v6  ;;  %v3622_v42 = vand.u32 4294901760, %v907_v11  ;;  %v910_v43 = vsel %vm395_vm1, %v3606_v12, 0  ;;  %v3637_v50 = vld [vmem:[%s3461_s19 + $0x18] sm:$0xff]  ;;  %s3903_s19 = scalar_lea.hbm %s3955_s6, %s2433_s11  ;;  %p3105_p9 = pnand %p3104_p7, %p3098_p4 }
  0xab   : > { %2809 = vmatprep.subr.bf16.mxu1 %v3572_v59  ;;  %2734 = vmatprep.subr.bf16.mxu0 %v3181_v0  ;;  %v1087_v4 = vand.u32 4294901760, %v1086_v62  ;;  %v892_v44 = vsel %vm395_vm1, %v3609_v33, 0  ;;  %v2741_v45 = vpack.c.bf16 %v3496_v21, %v3490_v18  ;;  %v2781_v46 = vpack.c.bf16 %v3561_v52, %v3556_v49 }
  0xac   : > { %2811 = vmatpush3.bf16.msra.mxu1 %v3572_v59  ;;  %v3632_v47 = vand.u32 4294901760, %v889_v34  ;;  %v895_v48 = vsel %vm395_vm1, %v3615_v36, 0  ;;  %v3643_v51 = vand.u32 4294901760, %v910_v43  ;;  %v3645_v54 = vand.u32 4294901760, %v892_v44 }
  0xad   : > { %v3597_v7 = vpack.c.bf16 %v1087_v4, %v1080_v2  ;;  %v3648_v55 = vand.u32 4294901760, %v895_v48  ;;  %v898_v60 = vsel %vm395_vm1, %v3637_v50, 0  ;;  %v3658_v62 = vpack.c.bf16 %v916_v23, %v913_v14 }
  0xae   : > { %2736 = vmatpush3.bf16.msra.mxu0 %v2735_v61  ;;  %v982_v61 = vsub.f32 %v889_v34, %v3632_v47  ;;  %v992_v2 = vsub.f32 %v892_v44, %v3645_v54  ;;  %v3662_v4 = vand.u32 4294901760, %v898_v60  ;;  %v3671_v10 = vpack.c.bf16 %v922_v40, %v919_v32 }
  0xaf   : > { %2737 = vmatprep.subr.bf16.mxu0 %v3181_v0  ;;  %2810 = vmatprep.subr.bf16.mxu1 %v3597_v7  ;;  %v1022_v14 = vsub.f32 %v3565_v53, %v3570_v58  ;;  %v2750_v19 = vpack.c.bf16 %v488_v25, %v481_v24  ;;  %v1032_v23 = vsub.f32 %v904_v6, %v3618_v39  ;;  %vm1887_vm3 = vcmask 1042434  }
  0xb0   : > { %2812 = vmatpush3.bf16.msra.mxu1 %v3597_v7  ;;  %v1012_v13 = vsub.f32 %v898_v60, %v3662_v4  ;;  %v2793_v28 = vpack.c.bf16 %v1071_v38, %v1064_v35  ;;  %v1042_v16 = vsub.f32 %v907_v11, %v3622_v42  ;;  %v2753_v17 = vpack.c.bf16 %v502_v31, %v495_v27 }
  0xb1   : > { %2559 = vmatmul.mubr.f32.vlgmr.msra.gmra.mrb[0].mxu0 %v3498_v22  ;;  %2778 = vmatprep.subr.bf16.mxu1 %v2777_v9  ;;  %v1052_v24 = vsub.f32 %v910_v43, %v3643_v51  ;;  %v983_v25 = vand.u32 4294901760, %v982_v61  ;;  %v993_v26 = vand.u32 4294901760, %v992_v2  ;;  %v2797_v21 = vpack.c.bf16 %v1085_v57, %v1078_v56 }
  0xb2   : > { %2739 = vmatpush3.bf16.msra.mxu0 %v2738_v8  ;;  %2569 = vmatprep.mubr.msk.f32.mxu0 %vm3182_vm0, %v3183_v1  ;;  %v1002_v8 = vsub.f32 %v895_v48, %v3648_v55  ;;  %v1023_v30 = vand.u32 4294901760, %v1022_v14  ;;  %v1043_v31 = vand.u32 4294901760, %v1042_v16  ;;  %v3184_v11 = vmov 1966171168  }
  0xb3   : > { %2740 = vmatprep.subr.bf16.mxu0 %v3181_v0  ;;  %2640 = vmatmul.mubr.f32.vlgmr.msra.gmra.mrb[0].mxu1 %v3618_v39  ;;  %v984_v27 = vsub.f32 %v982_v61, %v983_v25  ;;  %v994_v32 = vsub.f32 %v992_v2, %v993_v26  ;;  %v1701_v34 = vunpack.c.l.s4 %v3184_v11  ;;  %v1703_v43 = vlaneseq }
  0xb4   : > { %2780 = vmatpush3.bf16.msra.mxu1 %v2777_v9  ;;  %2642 = vmatprep.mubr.f32.mxu1 %v3622_v42  ;;  %v1003_v18 = vand.u32 4294901760, %v1002_v8  ;;  %v1024_v38 = vsub.f32 %v1022_v14, %v1023_v30  ;;  %v1044_v53 = vsub.f32 %v1042_v16, %v1043_v31  ;;  %vm1889_vm4 = vcmask 1043459  }
  0xb5   : > { %2782 = vmatprep.subr.bf16.mxu1 %v2781_v46  ;;  %v995_v35 = vand.u32 4294901760, %v994_v32  ;;  %v1702_v44 = vunpack.c.0.s8 %v1701_v34  ;;  %vm1891_vm5 = vcmask 1044484   ;;  %vm1893_vm6 = vcmask 1045509  }
  0xb6   : > { %2742 = vmatpush3.bf16.msra.mxu0 %v2741_v45  ;;  %v1025_v52 = vand.u32 4294901760, %v1024_v38  ;;  %v1045_v6 = vand.u32 4294901760, %v1044_v53  ;;  %v3750_v45 = vshrl.u32 %v1703_v43, 7  ;;  %vm1895_vm7 = vcmask 1046534  }
  0xb7   : > { %2743 = vmatprep.subr.bf16.mxu0 %v3181_v0  ;;  %2643 = vmatmul.mubr.f32.gmra.mrb[2].mxu1 %v3643_v51  ;;  %vm1897_vm8 = vcmask 1047559   ;;  %vm1900_vm9 = vcmask 64512  }
  0xb8   : > { %2784 = vmatpush3.bf16.msra.mxu1 %v2781_v46  ;;  %2653 = vmatprep.mubr.f32.mxu1 %v982_v61  ;;  %v2430_v46 = vld [vmem:[%s3953_s4] ss:$0 sm:$0xff] }
  0xb9   : > { %2570 = vmatmul.mubr.f32.vlgmr.msra.gmra.mrb[0].mxu0 %v3514_v29  ;;  %2786 = vmatprep.subr.bf16.mxu1 %v3658_v62  ;;  %v1013_v29 = vand.u32 4294901760, %v1012_v13 }
  0xba   : > { %2745 = vmatpush3.bf16.msra.mxu0 %v3484_v15  ;;  %2580 = vmatprep.mubr.msk.f32.mxu0 %vm3182_vm0, %v3183_v1 }
  0xbb   : > { %2746 = vmatprep.subr.bf16.mxu0 %v3181_v0  ;;  %2654 = vmatmul.mubr.f32.vlgmr.msra.gmra.mrb[4].mxu1 %v992_v2 }
  0xbc   : > { %2788 = vmatpush3.bf16.msra.mxu1 %v3658_v62  ;;  %2656 = vmatprep.mubr.f32.mxu1 %v1002_v8 }
  0xbd   : > { %2790 = vmatprep.subr.bf16.mxu1 %v3671_v10 }
  0xbe   : > { %2748 = vmatpush3.bf16.msra.mxu0 %v3494_v20 }
  0xbf   : > { %2749 = vmatprep.subr.bf16.mxu0 %v3181_v0  ;;  %2657 = vmatmul.mubr.f32.gmra.mrb[6].mxu1 %v1012_v13 }
  0xc0   : > { %2659 = vmatprep.mubr.f32.mxu1 %v1022_v14  ;;  %2792 = vmatpush3.bf16.msra.mxu1 %v3671_v10 }
  0xc1   : > { %2581 = vmatmul.mubr.f32.vlgmr.msra.gmra.mrb[0].mxu0 %v470_v37  ;;  %2794 = vmatprep.subr.bf16.mxu1 %v2793_v28  ;;  %v1014_v37 = vsub.f32 %v1012_v13, %v1013_v29 }
  0xc2   : > { %2751 = vmatpush3.bf16.msra.mxu0 %v2750_v19  ;;  %2591 = vmatprep.mubr.msk.f32.mxu0 %vm3182_vm0, %v3183_v1 }
  0xc3   : > { %2752 = vmatprep.subr.bf16.mxu0 %v3181_v0  ;;  %2660 = vmatmul.mubr.f32.gmra.mrb[0].mxu1 %v1032_v23  ;;  %v1015_v40 = vand.u32 4294901760, %v1014_v37 }
  0xc4   : > { %2662 = vmatprep.mubr.f32.mxu1 %v1042_v16 }
  0xc6   : > { %2754 = vmatpush3.bf16.msra.mxu0 %v2753_v17 }
  0xc7   : > { %2755 = vmatprep.subr.bf16.mxu0 %v3181_v0  ;;  %2663 = vmatmul.mubr.f32.gmra.mrb[2].mxu1 %v1052_v24 }
  0xc8   : > { %2673 = vmatprep.mubr.f32.mxu1 %v983_v25 }
  0xc9   : > { %2592 = vmatmul.mubr.f32.vlgmr.msra.gmra.mrb[0].mxu0 %v3498_v22 }
  0xca   : > { %2757 = vmatpush3.bf16.msra.mxu0 %v3484_v15  ;;  %2602 = vmatprep.mubr.msk.f32.mxu0 %vm3182_vm0, %v3183_v1  ;;  %v985_v15 = vand.u32 4294901760, %v984_v27  ;;  %v1033_v1 = vand.u32 4294901760, %v1032_v23 }
  0xcb   : > { %2758 = vmatprep.subr.bf16.mxu0 %v3181_v0  ;;  %2674 = vmatmul.mubr.f32.vlgmr.msra.gmra.mrb[4].mxu1 %v993_v26  ;;  %v1004_v0 = vsub.f32 %v1002_v8, %v1003_v18 }
  0xcc   : > { %2796 = vmatpush3.bf16.msra.mxu1 %v2793_v28  ;;  %2676 = vmatprep.mubr.f32.mxu1 %v1003_v18  ;;  %v1034_v49 = vsub.f32 %v1032_v23, %v1033_v1 }
  0xcd   : > { %2798 = vmatprep.subr.bf16.mxu1 %v2797_v21 }
  0xce   : > { %2760 = vmatpush3.bf16.msra.mxu0 %v3494_v20  ;;  %v1053_v20 = vand.u32 4294901760, %v1052_v24  ;;  %v1035_v56 = vand.u32 4294901760, %v1034_v49 }
  0xcf   : > { %2762 = vmatprep.subr.bf16.mxu0 %v3658_v62  ;;  %2677 = vmatmul.mubr.f32.gmra.mrb[6].mxu1 %v1013_v29 }
  0xd0   : > { %2679 = vmatprep.mubr.f32.mxu1 %v1023_v30  ;;  %2800 = vmatpush3.bf16.msra.mxu1 %v2797_v21  ;;  %v1054_v57 = vsub.f32 %v1052_v24, %v1053_v20 }
  0xd1   : > { %2603 = vmatmul.mubr.f32.vlgmr.msra.gmra.mrb[0].mxu0 %v3498_v22  ;;  %2802 = vmatprep.subr.bf16.mxu1 %v3658_v62  ;;  %v1005_v22 = vand.u32 4294901760, %v1004_v0 }
  0xd2   : > { %2764 = vmatpush3.bf16.msra.mxu0 %v3658_v62  ;;  %2613 = vmatprep.mubr.f32.mxu0 %v985_v15 }
  0xd3   : > { %2766 = vmatprep.subr.bf16.mxu0 %v3671_v10  ;;  %2680 = vmatmul.mubr.f32.gmra.mrb[0].mxu1 %v1033_v1 }
  0xd4   : > { %2682 = vmatprep.mubr.f32.mxu1 %v1043_v31 }
  0xd6   : > { %2768 = vmatpush3.bf16.msra.mxu0 %v3671_v10 }
  0xd7   : > { %2770 = vmatprep.subr.bf16.mxu0 %v3572_v59  ;;  %2683 = vmatmul.mubr.f32.gmra.mrb[2].mxu1 %v1053_v20 }
  0xd8   : > { %2693 = vmatprep.mubr.f32.mxu1 %v3632_v47 }
  0xd9   : > { %2614 = vmatmul.mubr.f32.vlgmr.msra.gmra.mrb[2].mxu0 %v995_v35 }
  0xda   : > { %2772 = vmatpush3.bf16.msra.mxu0 %v3572_v59  ;;  %2616 = vmatprep.mubr.f32.mxu0 %v1005_v22  ;;  %v1055_v59 = vand.u32 4294901760, %v1054_v57 }
  0xdb   : > { %2774 = vmatprep.subr.bf16.mxu0 %v3597_v7  ;;  %2694 = vmatmul.mubr.f32.vlgmr.msra.gmra.mrb[4].mxu1 %v3645_v54 }
  0xdc   : > { %2804 = vmatpush3.bf16.msra.mxu1 %v3658_v62  ;;  %2696 = vmatprep.mubr.f32.mxu1 %v3648_v55 }
  0xdd   : > { %2617 = vmatmul.mubr.f32.gmra.mrb[4].mxu0 %v1015_v40  ;;  %2806 = vmatprep.subr.bf16.mxu1 %v3671_v10 }
  0xde   : > { %2619 = vmatprep.mubr.f32.mxu0 %v1025_v52  ;;  %2776 = vmatpush3.bf16.msra.mxu0 %v3597_v7 }
  0xdf   : > { %2697 = vmatmul.mubr.f32.gmra.mrb[6].mxu1 %v3662_v4 }
  0xe0   : > { %2699 = vmatprep.mubr.f32.mxu1 %v3570_v58  ;;  %2808 = vmatpush3.bf16.msra.mxu1 %v3671_v10  ;;  %v3757_v10 = vsub.s32 0, %v3750_v45 }
  0xe1   : > { %2620 = vmatmul.mubr.f32.gmra.mrb[6].mxu0 %v1035_v56 }
  0xe2   : > { %2622 = vmatprep.mubr.f32.mxu0 %v1045_v6 }
  0xe3   : > { %2700 = vmatmul.mubr.f32.gmra.mrb[0].mxu1 %v3618_v39 }
  0xe4   : > { %2702 = vmatprep.mubr.f32.mxu1 %v3622_v42 }
  0xe5   : > { %2623 = vmatmul.mubr.f32.gmra.mrb[8].mxu0 %v1055_v59 }
  0xe6   : > { %2633 = vmatprep.mubr.f32.mxu0 %v3632_v47 }
  0xe7   : > { %2703 = vmatmul.mubr.f32.gmra.mrb[2].mxu1 %v3643_v51 }
  0xe8   : > { %2713 = vmatprep.mubr.f32.mxu1 %v3632_v47 }
  0xe9   : > { %2634 = vmatmul.mubr.f32.vlgmr.msra.gmra.mrb[2].mxu0 %v3645_v54 }
  0xea   : > { %2636 = vmatprep.mubr.f32.mxu0 %v3648_v55 }
  0xeb   : > { %2714 = vmatmul.mubr.f32.vlgmr.msra.gmra.mrb[4].mxu1 %v3645_v54 }
  0xec   : > { %2716 = vmatprep.mubr.f32.mxu1 %v3648_v55 }
  0xed   : > { %2637 = vmatmul.mubr.f32.gmra.mrb[4].mxu0 %v3662_v4 }
  0xef   : > { %2717 = vmatmul.mubr.f32.gmra.mrb[6].mxu1 %v3662_v4 }
  0xf0   : > { %2719 = vmatprep.mubr.f32.mxu1 %v3570_v58 }
  0xf3   : > { %2720 = vmatmul.mubr.f32.gmra.mrb[0].mxu1 %v3618_v39  ;;  %v1705_v39 = vsub.s32 %v1702_v44, %v3750_v45  ;;  %v2431_v44 = vld [vmem:[%s3954_s5] ss:$0 sm:$0xff] }
  0xf4   : > { %2722 = vmatprep.mubr.f32.mxu1 %v3622_v42 }
  0xf7   : > { %2723 = vmatmul.mubr.f32.gmra.mrb[2].mxu1 %v3643_v51 }
 0x1a4   : > { %v880_v7 = vpop.f32.mrb[0].mxu0 }
 0x1a5   : > { %v2604_v9 = vpop.f32.mrb[1].mxu0  ;;  %v2813_v58 = vadd.f32 %v2430_v46, %v880_v7 }
 0x1a7   : > { %v1706_v47 = vrot.slane %v2813_v58, %v1705_v39  ;;  %v1699_v51 = vcombine.high %v2813_v58, %v2813_v58 }
 0x1a9   : > { %v1714_v54 = vcombine.high %v1706_v47, %v1706_v47  ;;  %v1713_v61 = vrot.slane %v1699_v51, %v1705_v39  ;;  %v1722_v4 = vrot.slane %v1706_v47, %v1705_v39 }
 0x1ab   : > { %v1736_v2 = vrot.slane %v1714_v54, %v1705_v39  ;;  %v1715_v14 = vcombine.high %v1713_v61, %v1713_v61  ;;  %v1751_v25 = vrot.slane %v1722_v4, %v3757_v10  ;;  %v1744_v18 = vcombine.high %v1722_v4, %v1722_v4 }
 0x1ac   : > { %v1729_v20 = vrot.slane %v1713_v61, %v1705_v39 }
 0x1ad   : > { %v1755_v23 = vrot.slane %v1736_v2, %v3757_v10  ;;  %v1746_v17 = vcombine.high %v1736_v2, %v1736_v2  ;;  %v1743_v31 = vrot.slane %v1715_v14, %v1705_v39  ;;  %v1759_v0 = vrot.slane %v1744_v18, %v3757_v10 }
 0x1ae   : > { %v1767_v56 = vrot.slane %v1729_v20, %v3757_v10  ;;  %v1745_v57 = vcombine.high %v1729_v20, %v1729_v20 }
 0x1af   : > { %v1763_v15 = vrot.slane %v1746_v17, %v3757_v10  ;;  %v1771_v40 = vrot.slane %v1743_v31, %v3757_v10  ;;  %v1747_v52 = vcombine.high %v1743_v31, %v1743_v31 }
 0x1b0   : > { %v1775_v58 = vrot.slane %v1745_v57, %v3757_v10 }
 0x1b1   : > { %v1779_v11 = vrot.slane %v1747_v52, %v3757_v10 }
 0x1b4   : > { %v2621_v42 = vpop.f32.mrb[6].mxu0 }
 0x1b5   : > { %v1027_v48 = vpop.f32.mrb[7].mxu0 }
 0x1b8   : > { %v2624_v55 = vpop.f32.mrb[8].mxu0 }
 0x1b9   : > { %v1047_v60 = vpop.f32.mrb[9].mxu0 }
 0x1bc   : > { %v2635_v62 = vpop.f32.mrb[2].mxu0 }
 0x1bd   : > { %v1148_v8 = vpop.f32.mrb[3].mxu0 }
 0x1be   : > { %v2715_v13 = vpop.f32.mrb[4].mxu1 }
 0x1bf   : > { %v2814_v19 = vadd.f32 %v2715_v13, %v2635_v62  ;;  %v1652_v28 = vpop.f32.mrb[5].mxu1 }
 0x1c0   : > { %v2638_v16 = vpop.f32.mrb[4].mxu0  ;;  %v2815_v24 = vadd.f32 %v1652_v28, %v1148_v8 }
 0x1c1   : > { %v1160_v26 = vpop.f32.mrb[5].mxu0  ;;  %v1789_v21 = vadd.f32 %v2814_v19, %v1755_v23 }
 0x1c2   : > { %v1788_v27 = vadd.f32 %v2815_v24, %v1751_v25  ;;  %v2718_v29 = vpop.f32.mrb[6].mxu1 }
 0x1c3   : > { %2945 = vtanh.f32 %v1789_v21  ;;  %v2816_v30 = vadd.f32 %v2718_v29, %v2638_v16  ;;  %v1664_v1 = vpop.f32.mrb[7].mxu1  ;;  %v1852_v29 = vand.u32 127, %v1703_v43 }
 0x1c4   : > { %2947 = vtanh.f32 %v1788_v27  ;;  %v2817_v32 = vadd.f32 %v1664_v1, %v1160_v26 }
 0x1c5   : > { %v1791_v35 = vadd.f32 %v2816_v30, %v1763_v15  ;;  %v3780_v15 = vsub.s32 %v1852_v29, %v3750_v45 }
 0x1c6   : > { %v1790_v37 = vadd.f32 %v2817_v32, %v1759_v0  ;;  %v2721_v22 = vpop.f32.mrb[0].mxu1 }
 0x1c7   : > { %2949 = vtanh.f32 %v1791_v35  ;;  %v2818_v38 = vadd.f32 %v2721_v22, %v2621_v42  ;;  %v1676_v49 = vpop.f32.mrb[1].mxu1 }
 0x1c8   : > { %2951 = vtanh.f32 %v1790_v37  ;;  %v2819_v53 = vadd.f32 %v1676_v49, %v1027_v48 }
 0x1c9   : > { %v1793_v6 = vadd.f32 %v2818_v38, %v1771_v40 }
 0x1ca   : > { %v1792_v59 = vadd.f32 %v2819_v53, %v1767_v56  ;;  %v2724_v7 = vpop.f32.mrb[2].mxu1 }
 0x1cb   : > { %2953 = vtanh.f32 %v1793_v6  ;;  %v2820_v9 = vadd.f32 %v2724_v7, %v2624_v55  ;;  %v1688_v34 = vpop.f32.mrb[3].mxu1 }
 0x1cc   : > { %2955 = vtanh.f32 %v1792_v59  ;;  %v2821_v46 = vadd.f32 %v1688_v34, %v1047_v60 }
 0x1cd   : > { %v2946_v39 = vpop.eup %2945  ;;  %v1795_v47 = vadd.f32 %v2820_v9, %v1779_v11 }
 0x1ce   : > { %v2948_v42 = vpop.eup %2947  ;;  %v1794_v48 = vadd.f32 %v2821_v46, %v1775_v58  ;;  %v1812_v51 = vmul.f32 %v2946_v39, %v2431_v44  ;;  %v3185_v46 = vmov 0   ;;  %v1911_v58 = vsub.s32 1, %v3750_v45 }
 0x1cf   : > { %2957 = vtanh.f32 %v1795_v47  ;;  %v1811_v55 = vmul.f32 %v2948_v42, %v2431_v44  ;;  %2944 = vset.pattern.permute.xlu0 %v3185_v46  ;;  %2943 = vset.pattern.permute.xlu1 %v3185_v46  ;;  %v1915_v39 = vsub.s32 2, %v3750_v45  ;;  %v1919_v47 = vsub.s32 3, %v3750_v45 }
 0x1d0   : > { %2959 = vtanh.f32 %v1794_v48  ;;  %v1822_v54 = vsel %vm395_vm1, %v1812_v51, 0.0 }
 0x1d1   : > { %v2950_v61 = vpop.eup %2949  ;;  %1823 = vadd.xlane.f32.xlu0 %v1822_v54  ;;  %v1819_v4 = vsel %vm395_vm1, %v1811_v55, 0.0  ;;  %v1923_v55 = vsub.s32 4, %v3750_v45 }
 0x1d2   : > { %v2952_v62 = vpop.eup %2951  ;;  %v1814_v2 = vmul.f32 %v2950_v61, %v2431_v44 }
 0x1d3   : > { %v1813_v8 = vmul.f32 %v2952_v62, %v2431_v44 }
 0x1d4   : > { %v1828_v60 = vsel %vm395_vm1, %v1814_v2, 0.0 }
 0x1d5   : > { %v2954_v13 = vpop.eup %2953  ;;  %1820 = vadd.xlane.f32.xlu0 %v1819_v4  ;;  %1829 = vadd.xlane.f32.xlu1 %v1828_v60  ;;  %v1825_v23 = vsel %vm395_vm1, %v1813_v8, 0.0 }
 0x1d6   : > { %v2956_v14 = vpop.eup %2955  ;;  %v1816_v28 = vmul.f32 %v2954_v13, %v2431_v44  ;;  %v1927_v13 = vsub.s32 5, %v3750_v45 }
 0x1d7   : > { %v1815_v19 = vmul.f32 %v2956_v14, %v2431_v44 }
 0x1d8   : > { %v1834_v26 = vsel %vm395_vm1, %v1816_v28, 0.0  ;;  %v1931_v28 = vsub.s32 6, %v3750_v45 }
 0x1d9   : > { %v2958_v16 = vpop.eup %2957  ;;  %1826 = vadd.xlane.f32.xlu1 %v1825_v23  ;;  %v1831_v17 = vsel %vm395_vm1, %v1815_v19, 0.0 }
 0x1da   : > { %v2960_v24 = vpop.eup %2959  ;;  %1832 = vadd.xlane.f32.xlu0 %v1831_v17  ;;  %v1818_v18 = vmul.f32 %v2958_v16, %v2431_v44 }
 0x1db   : > { %v1817_v25 = vmul.f32 %v2960_v24, %v2431_v44 }
 0x1dc   : > { %v1840_v27 = vsel %vm395_vm1, %v1818_v18, 0.0 }
 0x1dd   : > { %1835 = vadd.xlane.f32.xlu1 %v1834_v26  ;;  %v1837_v21 = vsel %vm395_vm1, %v1817_v25, 0.0  ;;  %v1935_v25 = vsub.s32 7, %v3750_v45 }
 0x1de   : > { %1838 = vadd.xlane.f32.xlu0 %v1837_v21 }
 0x1e1   : > { %1841 = vadd.xlane.f32.xlu1 %v1840_v27 }
 0x25e   : > { %v1824_v30 = vpop.xlane.xlu0 %1823 }
 0x25f   : > { %v1860_v0 = vrot.slane %v1824_v30, %v3780_v15 }
 0x262   : > { %v1821_v1 = vpop.xlane.xlu0 %1820  ;;  %v1830_v31 = vpop.xlane.xlu1 %1829 }
 0x263   : > { %v1856_v32 = vrot.slane %v1821_v1, %v3780_v15  ;;  %v1868_v43 = vrot.slane %v1830_v31, %v3780_v15 }
 0x265   : > { %v1886_v22 = vsel %vm1885_vm2, %v1860_v0, %v1856_v32 }
 0x266   : > { %v1827_v20 = vpop.xlane.xlu1 %1826 }
 0x267   : > { %v1864_v35 = vrot.slane %v1827_v20, %v3780_v15  ;;  %v1833_v37 = vpop.xlane.xlu0 %1832 }
 0x268   : > { %v1872_v38 = vrot.slane %v1833_v37, %v3780_v15 }
 0x269   : > { %v1888_v40 = vsel %vm1887_vm3, %v1864_v35, %v1886_v22 }
 0x26a   : > { %v1890_v49 = vsel %vm1889_vm4, %v1868_v43, %v1888_v40  ;;  %v1836_v52 = vpop.xlane.xlu1 %1835 }
 0x26b   : > { %v1892_v53 = vsel %vm1891_vm5, %v1872_v38, %v1890_v49  ;;  %v1876_v56 = vrot.slane %v1836_v52, %v3780_v15  ;;  %v1839_v57 = vpop.xlane.xlu0 %1838 }
 0x26c   : > { %v1880_v6 = vrot.slane %v1839_v57, %v3780_v15 }
 0x26d   : > { %v1894_v59 = vsel %vm1893_vm6, %v1876_v56, %v1892_v53 }
 0x26e   : > { %v1842_v7 = vpop.xlane.xlu1 %1841  ;;  %v1896_v11 = vsel %vm1895_vm7, %v1880_v6, %v1894_v59 }
 0x26f   : > { %v1884_v9 = vrot.slane %v1842_v7, %v3780_v15 }
 0x271   : > { %v1898_v34 = vsel %vm1897_vm8, %v1884_v9, %v1896_v11 }
 0x272   : > { %v1901_v44 = vsel %vm1900_vm9, %v1898_v34, -inf }
 0x273   : > { %1902 = vmax.xlane.f32.xlu0 %v1901_v44 }
 0x300   : > { %v1903_v42 = vpop.xlane.xlu0 %1902 }
 0x301   : > { %v1908_v48 = vrot.slane %v1903_v42, %v3757_v10  ;;  %v1912_v51 = vrot.slane %v1903_v42, %v1911_v58  ;;  %v1916_v54 = vrot.slane %v1903_v42, %v1915_v39  ;;  %v1920_v61 = vrot.slane %v1903_v42, %v1919_v47 }
 0x302   : > { %v1924_v14 = vrot.slane %v1903_v42, %v1923_v55  ;;  %v1928_v16 = vrot.slane %v1903_v42, %v1927_v13  ;;  %v1932_v26 = vrot.slane %v1903_v42, %v1931_v28 }
 0x303   : > { %v1945_v62 = vsub.f32 %v1821_v1, %v1908_v48  ;;  %v1946_v2 = vsub.f32 %v1824_v30, %v1912_v51  ;;  %v1947_v4 = vsub.f32 %v1827_v20, %v1916_v54  ;;  %v1948_v19 = vsub.f32 %v1830_v31, %v1920_v61 }
 0x304   : > { %v1949_v17 = vsub.f32 %v1833_v37, %v1924_v14  ;;  %v1950_v18 = vsub.f32 %v1836_v52, %v1928_v16  ;;  %v1936_v30 = vrot.slane %v1903_v42, %v1935_v25  ;;  %v1951_v1 = vsub.f32 %v1839_v57, %v1932_v26 }
 0x305   : > { %v1953_v60 = vmul.f32 1.442695, %v1945_v62  ;;  %v1955_v8 = vmul.f32 1.442695, %v1946_v2  ;;  %v1957_v23 = vmul.f32 1.442695, %v1947_v4 }
 0x306   : > { %v1959_v24 = vmul.f32 1.442695, %v1948_v19  ;;  %v1961_v21 = vmul.f32 1.442695, %v1949_v17  ;;  %v1963_v31 = vmul.f32 1.442695, %v1950_v18  ;;  %v1952_v0 = vsub.f32 %v1842_v7, %v1936_v30 }
 0x307   : > { %2961 = vpow2.f32 %v1953_v60  ;;  %v1965_v20 = vmul.f32 1.442695, %v1951_v1 }
 0x308   : > { %2963 = vpow2.f32 %v1955_v8  ;;  %v1967_v37 = vmul.f32 1.442695, %v1952_v0 }
 0x309   : > { %2965 = vpow2.f32 %v1957_v23 }
 0x30a   : > { %2967 = vpow2.f32 %v1959_v24 }
 0x30b   : > { %2969 = vpow2.f32 %v1961_v21 }
 0x30c   : > { %2971 = vpow2.f32 %v1963_v31 }
 0x30d   : > { %2973 = vpow2.f32 %v1965_v20 }
 0x30e   : > { %2975 = vpow2.f32 %v1967_v37 }
 0x311   : > { %v2962_v27 = vpop.eup %2961 }
 0x312   : > { %v2964_v29 = vpop.eup %2963  ;;  %1978 = vperm.xlu1 %2943, %v2962_v27  }
 0x313   : > { %1981 = vperm.xlu0 %2944, %v2964_v29   ;;  %v2966_v32 = vpop.eup %2965 }
 0x314   : > { %v2968_v35 = vpop.eup %2967 }
 0x315   : > { %v2970_v22 = vpop.eup %2969 }
 0x316   : > { %1984 = vperm.xlu1 %2943, %v2966_v32   ;;  %v2972_v43 = vpop.eup %2971 }
 0x317   : > { %v2974_v38 = vpop.eup %2973 }
 0x318   : > { %v2976_v40 = vpop.eup %2975 }
 0x31a   : > { %1987 = vperm.xlu1 %2943, %v2968_v35  }
 0x31e   : > { %1990 = vperm.xlu1 %2943, %v2970_v22  }
 0x322   : > { %1993 = vperm.xlu1 %2943, %v2972_v43  }
 0x326   : > { %1996 = vperm.xlu1 %2943, %v2974_v38  }
 0x32a   : > { %1999 = vperm.xlu1 %2943, %v2976_v40  }
 0x391   : > { %v1979_v49 = vpop.permute.xlu1 %1978 }
 0x392   : > { %v1982_v57 = vpop.permute.xlu0 %1981  ;;  %v2004_v7 = vrot.slane %v1979_v49, %v3780_v15 }
 0x393   : > { %v2008_v59 = vrot.slane %v1982_v57, %v3780_v15 }
 0x395   : > { %v1985_v52 = vpop.permute.xlu1 %1984  ;;  %v2033_v46 = vsel %vm1885_vm2, %v2008_v59, %v2004_v7 }
 0x396   : > { %v2012_v9 = vrot.slane %v1985_v52, %v3780_v15 }
 0x398   : > { %v2034_v48 = vsel %vm1887_vm3, %v2012_v9, %v2033_v46 }
 0x399   : > { %v1988_v53 = vpop.permute.xlu1 %1987 }
 0x39a   : > { %v2016_v11 = vrot.slane %v1988_v53, %v3780_v15 }
 0x39c   : > { %v2035_v54 = vsel %vm1889_vm4, %v2016_v11, %v2034_v48 }
 0x39d   : > { %v1991_v56 = vpop.permute.xlu1 %1990 }
 0x39e   : > { %v2020_v34 = vrot.slane %v1991_v56, %v3780_v15 }
 0x3a0   : > { %v2036_v61 = vsel %vm1891_vm5, %v2020_v34, %v2035_v54 }
 0x3a1   : > { %v1994_v6 = vpop.permute.xlu1 %1993 }
 0x3a2   : > { %v2024_v42 = vrot.slane %v1994_v6, %v3780_v15 }
 0x3a4   : > { %v2037_v2 = vsel %vm1893_vm6, %v2024_v42, %v2036_v61 }
 0x3a5   : > { %v1997_v44 = vpop.permute.xlu1 %1996 }
 0x3a6   : > { %v2028_v51 = vrot.slane %v1997_v44, %v3780_v15 }
 0x3a8   : > { %v2038_v60 = vsel %vm1895_vm7, %v2028_v51, %v2037_v2 }
 0x3a9   : > { %v2000_v62 = vpop.permute.xlu1 %1999 }
 0x3aa   : > { %v2032_v4 = vrot.slane %v2000_v62, %v3780_v15 }
 0x3ac   : > { %v2039_v8 = vsel %vm1897_vm8, %v2032_v4, %v2038_v60 }
 0x3ad   : > { %v2041_v14 = vsel %vm1900_vm9, %v2039_v8, 0.0 }
 0x3ae   : > { %2042 = vadd.xlane.f32.xlu1 %v2041_v14 }
 0x43b   : > { %v2043_v19 = vpop.xlane.xlu1 %2042 }
 0x43c   : > { %2977 = vrcp.f32 %v2043_v19 }
 0x446   : > { %v2978_v23 = vpop.eup %2977 }
 0x447   : > { %v2049_v16 = vrot.slane %v2978_v23, %v3757_v10  ;;  %v2053_v24 = vrot.slane %v2978_v23, %v1911_v58  ;;  %v2057_v18 = vrot.slane %v2978_v23, %v1915_v39  ;;  %v2061_v30 = vrot.slane %v2978_v23, %v1919_v47 }
 0x448   : > { %v2065_v31 = vrot.slane %v2978_v23, %v1923_v55  ;;  %v2069_v58 = vrot.slane %v2978_v23, %v1927_v13  ;;  %v2073_v39 = vrot.slane %v2978_v23, %v1931_v28  ;;  %v2077_v47 = vrot.slane %v2978_v23, %v1935_v25 }
 0x449   : > { %v2086_v17 = vmul.f32 %v2962_v27, %v2049_v16  ;;  %v2087_v26 = vmul.f32 %v2964_v29, %v2053_v24  ;;  %v2088_v21 = vmul.f32 %v2966_v32, %v2057_v18  ;;  %v2089_v1 = vmul.f32 %v2968_v35, %v2061_v30 }
 0x44a   : > { %v2090_v10 = vmul.f32 %v2970_v22, %v2065_v31  ;;  %v2091_v27 = vmul.f32 %v2972_v43, %v2069_v58  ;;  %v2092_v29 = vmul.f32 %v2974_v38, %v2073_v39  ;;  %v2093_v32 = vmul.f32 %v2976_v40, %v2077_v47 }
 0x44b   : > { %2096 = vperm.xlu0 %2944, %v2086_v17  }
 0x44f   : > { %2101 = vperm.xlu0 %2944, %v2087_v26  }
 0x453   : > { %2106 = vperm.xlu0 %2944, %v2088_v21  }
 0x457   : > { %2111 = vperm.xlu0 %2944, %v2089_v1  }
 0x45b   : > { %2116 = vperm.xlu0 %2944, %v2090_v10  }
 0x45f   : > { %2121 = vperm.xlu0 %2944, %v2091_v27  }
 0x463   : > { %2126 = vperm.xlu0 %2944, %v2092_v29  }
 0x467   : > { %2131 = vperm.xlu0 %2944, %v2093_v32  }
 0x4ca   : > { %v2097_v0 = vpop.permute.xlu0 %2096 }
 0x4cb   : > { %v2134_v35 = vmul.f32 %v2097_v0, %v3593_v5  ;;  %v2218_v34 = vrot.slane %v2097_v0, %v3780_v15 }
 0x4cd   : > { %v2142_v22 = vsel %vm395_vm1, %v2134_v35, 0.0 }
 0x4ce   : > { %v2102_v55 = vpop.permute.xlu0 %2101  ;;  %v2143_v40 = vrot.slane %v2142_v22, 4 }
 0x4cf   : > { %v2135_v20 = vmul.f32 %v2102_v55, %v3609_v33 }
 0x4d0   : > { %v2144_v56 = vadd.f32 %v2143_v40, %v2142_v22 }
 0x4d1   : > { %v2149_v28 = vsel %vm395_vm1, %v2135_v20, 0.0 }
 0x4d2   : > { %v2107_v13 = vpop.permute.xlu0 %2106  ;;  %v2150_v38 = vrot.slane %v2149_v28, 4 }
 0x4d3   : > { %v2136_v37 = vmul.f32 %v2107_v13, %v3615_v36  ;;  %v2226_v46 = vrot.slane %v2107_v13, %v3780_v15 }
 0x4d4   : > { %v2151_v36 = vadd.f32 %v2150_v38, %v2149_v28 }
 0x4d5   : > { %v2156_v45 = vsel %vm395_vm1, %v2136_v37, 0.0 }
 0x4d6   : > { %v2112_v25 = vpop.permute.xlu0 %2111  ;;  %v2157_v49 = vrot.slane %v2156_v45, 4  ;;  %v2152_v44 = vrot.slane %v2151_v36, 2 }
 0x4d7   : > { %v2137_v43 = vmul.f32 %v2112_v25, %v3637_v50  ;;  %v2222_v50 = vrot.slane %v2102_v55, %v3780_v15  ;;  %v2230_v51 = vrot.slane %v2112_v25, %v3780_v15 }
 0x4d8   : > { %v2158_v57 = vadd.f32 %v2157_v49, %v2156_v45  ;;  %v2153_v19 = vadd.f32 %v2152_v44, %v2151_v36 }
 0x4d9   : > { %v2163_v33 = vsel %vm395_vm1, %v2137_v43, 0.0  ;;  %v2247_v4 = vsel %vm1885_vm2, %v2222_v50, %v2218_v34 }
 0x4da   : > { %v2164_v52 = vrot.slane %v2163_v33, 4  ;;  %v2117_v5 = vpop.permute.xlu0 %2116  ;;  %v2159_v48 = vrot.slane %v2158_v57, 2  ;;  %v2248_v23 = vsel %vm1887_vm3, %v2226_v46, %v2247_v4  ;;  %v2154_v47 = vrot.slane %v2153_v19, 1 }
 0x4db   : > { %v2138_v53 = vmul.f32 %v2117_v5, %v3540_v41  ;;  %v2145_v41 = vrot.slane %v2144_v56, 2  ;;  %v2234_v62 = vrot.slane %v2117_v5, %v3780_v15  ;;  %v2249_v18 = vsel %vm1889_vm4, %v2230_v51, %v2248_v23 }
 0x4dc   : > { %v2165_v59 = vadd.f32 %v2164_v52, %v2163_v33  ;;  %v2160_v26 = vadd.f32 %v2159_v48, %v2158_v57 }
 0x4dd   : > { %v2170_v6 = vsel %vm395_vm1, %v2138_v53, 0.0  ;;  %v2146_v24 = vadd.f32 %v2145_v41, %v2144_v56  ;;  %v2250_v1 = vsel %vm1891_vm5, %v2234_v62, %v2249_v18 }
 0x4de   : > { %v2171_v7 = vrot.slane %v2170_v6, 4  ;;  %v2122_v9 = vpop.permute.xlu0 %2121  ;;  %v2166_v61 = vrot.slane %v2165_v59, 2  ;;  %v2161_v20 = vrot.slane %v2160_v26, 1 }
 0x4df   : > { %v2139_v11 = vmul.f32 %v2122_v9, %v3583_v63  ;;  %v2238_v8 = vrot.slane %v2122_v9, %v3780_v15  ;;  %v2147_v37 = vrot.slane %v2146_v24, 1 }
 0x4e0   : > { %v2172_v42 = vadd.f32 %v2171_v7, %v2170_v6  ;;  %v2167_v30 = vadd.f32 %v2166_v61, %v2165_v59  ;;  %v2162_v40 = vadd.f32 %v2161_v20, %v2160_v26 }
 0x4e1   : > { %v2177_v54 = vsel %vm395_vm1, %v2139_v11, 0.0  ;;  %v2251_v27 = vsel %vm1893_vm6, %v2238_v8, %v2250_v1  ;;  %v2148_v49 = vadd.f32 %v2147_v37, %v2146_v24 }
 0x4e2   : > { %v2178_v2 = vrot.slane %v2177_v54, 4  ;;  %v2127_v63 = vpop.permute.xlu0 %2126  ;;  %v2173_v60 = vrot.slane %v2172_v42, 2  ;;  %v2168_v28 = vrot.slane %v2167_v30, 1 }
 0x4e3   : > { %v2140_v14 = vmul.f32 %v2127_v63, %v3588_v3  ;;  %v2242_v17 = vrot.slane %v2127_v63, %v3780_v15 }
 0x4e4   : > { %v2179_v16 = vadd.f32 %v2178_v2, %v2177_v54  ;;  %v2174_v3 = vadd.f32 %v2173_v60, %v2172_v42  ;;  %v2169_v33 = vadd.f32 %v2168_v28, %v2167_v30 }
 0x4e5   : > { %v2184_v21 = vsel %vm395_vm1, %v2140_v14, 0.0  ;;  %v2252_v55 = vsel %vm1895_vm7, %v2242_v17, %v2251_v27 }
 0x4e6   : > { %v2180_v31 = vrot.slane %v2179_v16, 2  ;;  %v2185_v10 = vrot.slane %v2184_v21, 4  ;;  %v2132_v58 = vpop.permute.xlu0 %2131  ;;  %v2175_v25 = vrot.slane %v2174_v3, 1 }
 0x4e7   : > { %v2141_v39 = vmul.f32 %v2132_v58, %v3606_v12  ;;  %v2246_v29 = vrot.slane %v2132_v58, %v3780_v15  ;;  %v2155_v12 = vadd.f32 %v2154_v47, %v2153_v19 }
 0x4e8   : > { %v2181_v32 = vadd.f32 %v2180_v31, %v2179_v16  ;;  %v2186_v0 = vadd.f32 %v2185_v10, %v2184_v21  ;;  %v2176_v53 = vadd.f32 %v2175_v25, %v2174_v3 }
 0x4e9   : > { %v2191_v35 = vsel %vm395_vm1, %v2141_v39, 0.0  ;;  %v2253_v13 = vsel %vm1897_vm8, %v2246_v29, %v2252_v55  ;;  %v2206_v36 = vsel %vm1885_vm2, %v2155_v12, %v2148_v49 }
 0x4ea   : > { %v2187_v22 = vrot.slane %v2186_v0, 2  ;;  %v2192_v45 = vrot.slane %v2191_v35, 4  ;;  %2255 = vst.msk [vmem:[%s374_s2] sm:$0xff] %vm1900_vm9, %v2253_v13  ;;  %v2182_v43 = vrot.slane %v2181_v32, 1  ;;  %v2207_v6 = vsel %vm1887_vm3, %v2162_v40, %v2206_v36 }
 0x4eb   : > { %v2208_v7 = vsel %vm1889_vm4, %v2169_v33, %v2207_v6 }
 0x4ec   : > { %v2188_v15 = vadd.f32 %v2187_v22, %v2186_v0  ;;  %v2193_v38 = vadd.f32 %v2192_v45, %v2191_v35  ;;  %v2183_v56 = vadd.f32 %v2182_v43, %v2181_v32  ;;  %v2209_v50 = vsel %vm1891_vm5, %v2176_v53, %v2208_v7 }
 0x4ee   : > { %v2189_v52 = vrot.slane %v2188_v15, 1  ;;  %v2194_v5 = vrot.slane %v2193_v38, 2  ;;  %v2210_v11 = vsel %vm1893_vm6, %v2183_v56, %v2209_v50 }
 0x4f0   : > { %v2195_v57 = vadd.f32 %v2194_v5, %v2193_v38  ;;  %v2190_v59 = vadd.f32 %v2189_v52, %v2188_v15 }
 0x4f2   : > { %v2196_v9 = vrot.slane %v2195_v57, 1  ;;  %v2211_v44 = vsel %vm1895_vm7, %v2190_v59, %v2210_v11 }
 0x4f4   : > { %v2197_v34 = vadd.f32 %v2196_v9, %v2195_v57 }
 0x4f6   : > { %v2212_v46 = vsel %vm1897_vm8, %v2197_v34, %v2211_v44 }
 0x4f7   : > { %2214 = vst.msk [vmem:[%s363_s13] sm:$0xff] %vm395_vm1, %v2212_v46 }
 0x4f8   : > { %3108 = shalt.err (!%p3105_p9)
}
 0x4f9   : > { %s3109_s29 = scalar_lea.hbm %s3903_s19, 128  ;;  %s3113_s14 = scalar_lea.hbm %s3955_s6, 256 }
 0x4fa   : > { %p3110_p0 = scmp.ne.s32.totalorder %s3903_s19, %s3109_s29  ;;  %p3114_p2 = scmp.lt.u32.totalorder %s3903_s19, %s3955_s6 }
 0x4fb   : > { %p3115_p12 = scmp.lt.u32.totalorder %s3113_s14, %s3109_s29  ;;  %p3117_p13 = scmp.lt.u32.totalorder %s3109_s29, %s3903_s19 }
 0x4fc   : > { %p3111_p8 = pnand %p3110_p0, %p3983_p6 }
 0x4fd   : > { %p3116_p1 = por %p3115_p12, %p3114_p2 }
 0x4fe   : > { %p3112_p11 = pneg %p3111_p8 }
 0x4ff   : > { %p3118_p10 = por %p3117_p13, %p3116_p1 }
 0x501   : > { %p3119_p4 = pnand %p3118_p10, %p3112_p11 }
 0x503   : > { %3122 = shalt.err (!%p3119_p4)
}
 0x504   : > { %2876 = dma.vmem_to_hbm [thread:$0]  (%p3983_p6), %s3905_s0, 128, %s3903_s19, %s2257_s28  }
 0x505 PF: > { %s2289_s2 = sand.u32 1, %s3161_s24   ;;  %p3984_p5 = scmp.ne.s32.totalorder %s3966_s8, 0 }
 0x506   : > { %p3985_p3 = scmp.ge.s32.totalorder %s3173_s27, 2  ;;  %s2290_s11 = scalar_lea.sflag [#allocation4], %s2289_s2 }
 0x508   : > { %p2893_p7 = pnand %p3985_p3, %p3984_p5 }
 0x50a   : > { %3156 = dma.done.wait (!%p2893_p7), %s2290_s11, 128  }
 0x50b   : > { %3158 = vsyncadd (!%p2893_p7), %s2290_s11, 4294967168  ;;  %p25_p9 = scmp.ge.s32.totalorder %s3343_s12, 4   ;;  %s3986_s24 = smov %s3165_s25 }
 0x50c   : > { %s3987_s25 = smov %s3169_s26  ;;  %s3988_s26 = smov %s3359_s17 }
 0x50d   : > { %s3989_s27 = smov %s3343_s12  ;;  %27 = sbr.rel (!%p25_p9) target bundleno = 12 (0xc), region = 122 }
 0x514   :  { %2302 = vsyncpa [#allocation3], 1 }
 0x515   :  { %2304 = vsyncpa [#allocation3 + $0x1], 1 }
 0x516   :  { %2305 = vsyncpa [#allocation6], 1 }
 0x517   :  { %2307 = vsyncpa [#allocation6 + $0x1], 1 }
 0x518   :  { %2308 = vsyncpa [#allocation9], 1 }
 0x519   :  { %2309 = vsyncpa [#allocation4], 1 }
 0x51a   :  { %2311 = vsyncpa [#allocation4 + $0x1], 1 }

</bundles_post_ra>
